<compile_context>
chip_gen: v7x
topology: tpu7x:2x2x1
jax: 0.10.0
libtpu: 0.0.40
codegen_flags: <defaults>
</compile_context>

<pallas_src>
import jax
import jax.numpy as jnp
from jax.experimental import pallas as pl
from jax.experimental.pallas import tpu as pltpu

NEG_SLOPE = 0.01  # torch.nn.LeakyReLU default negative_slope
D_IN = 1000
D_OUT = 10


def _leaky_relu(x):
    # slope < 1  ->  max(x, slope*x) == leaky_relu(x); 2 VPU ops vs 3 for where().
    return jnp.maximum(x, NEG_SLOPE * x)


def mlp_head_kernel(x_ref,
                    w1_ref, b1_ref,
                    w2_ref, b2_ref,
                    w3_ref, b3_ref,
                    w4_ref, b4_ref,
                    o_ref):
    # In-kernel f32 -> bf16 cast of the activations (free VPU op); all matmuls
    # accumulate in f32 on the MXU; epilogues stay f32 (portable to v5e).
    x = x_ref[...].astype(jnp.bfloat16)
    h = jnp.dot(x, w1_ref[...], preferred_element_type=jnp.float32)
    h = _leaky_relu(h + b1_ref[...])
    h = jnp.dot(h.astype(jnp.bfloat16), w2_ref[...],
                preferred_element_type=jnp.float32)
    h = _leaky_relu(h + b2_ref[...])
    h = jnp.dot(h.astype(jnp.bfloat16), w3_ref[...],
                preferred_element_type=jnp.float32)
    h = _leaky_relu(h + b3_ref[...])
    h = jnp.dot(h.astype(jnp.bfloat16), w4_ref[...],
                preferred_element_type=jnp.float32)
    o_ref[...] = (h + b4_ref[...]).astype(o_ref.dtype)


def _prepare_params(params):
    """Cast the fp32 master weights to bf16 once, outside the kernel."""
    (w1, b1), (w2, b2), (w3, b3), (w4, b4) = params
    return (w1.astype(jnp.bfloat16), b1.astype(jnp.float32),
            w2.astype(jnp.bfloat16), b2.astype(jnp.float32),
            w3.astype(jnp.bfloat16), b3.astype(jnp.float32),
            w4.astype(jnp.bfloat16), b4.astype(jnp.float32))


def hidden_layer_head(x, params, *, batch_tile=512):
    """x: [B, 1000] float32 features (output of the pretrained backbone)."""
    B = x.shape[0]
    prepared = _prepare_params(params)

    # Batch tile: multiple of 8 sublanes; single grid step whenever B <= tile.
    tb = min(batch_tile, B)
    tb = max(8, ((tb + 7) // 8) * 8)
    n_tiles = pl.cdiv(B, tb)
    B_pad = n_tiles * tb
    x_in = x if B_pad == B else jnp.pad(x, ((0, B_pad - B), (0, 0)))

    def resident(a):
        # Same block index at every grid step -> stays VMEM-resident, the
        # one-time HBM DMA is amortized over all batch tiles.
        return pl.BlockSpec(a.shape, lambda i: (0, 0))

    in_specs = [pl.BlockSpec((tb, D_IN), lambda i: (i, 0))]
    in_specs += [resident(a) for a in prepared]

    # "parallel" (megacore split) only once the batch is large enough that
    # activation traffic dominates; otherwise keep one core and one weight DMA.
    semantics = ("parallel",) if n_tiles >= 4 else ("arbitrary",)

    out = pl.pallas_call(
        mlp_head_kernel,
        out_shape=jax.ShapeDtypeStruct((B_pad, D_OUT), jnp.float32),
        grid=(n_tiles,),
        in_specs=in_specs,
        out_specs=pl.BlockSpec((tb, D_OUT), lambda i: (i, 0)),
        compiler_params=pltpu.CompilerParams(dimension_semantics=semantics),
    )(x_in, *prepared)

    return out if B_pad == B else out[:B]


def init_params(key):
    dims = [(1000, 512), (512, 512), (512, 256), (256, 10)]
    params = []
    for i, (din, dout) in enumerate(dims):
        kw, kb = jax.random.split(jax.random.fold_in(key, i))
        bound = 1.0 / jnp.sqrt(din)  # matches torch.nn.Linear default init range
        w = jax.random.uniform(kw, (din, dout), jnp.float32, -bound, bound)
        b = jax.random.uniform(kb, (1, dout), jnp.float32, -bound, bound)
        params.append((w, b))
    return params


def reference_head_bf16(x, params):
    """Pure-JAX reference with the same bf16-input / f32-accum numerics."""
    w1, b1, w2, b2, w3, b3, w4, b4 = _prepare_params(params)
    h = jnp.dot(x.astype(jnp.bfloat16), w1, preferred_element_type=jnp.float32)
    h = _leaky_relu(h + b1)
    h = jnp.dot(h.astype(jnp.bfloat16), w2, preferred_element_type=jnp.float32)
    h = _leaky_relu(h + b2)
    h = jnp.dot(h.astype(jnp.bfloat16), w3, preferred_element_type=jnp.float32)
    h = _leaky_relu(h + b3)
    h = jnp.dot(h.astype(jnp.bfloat16), w4, preferred_element_type=jnp.float32)
    return h + b4


def reference_head_f32(x, params):
    h = x
    for i, (w, b) in enumerate(params):
        h = h @ w + b
        if i < len(params) - 1:
            h = _leaky_relu(h)
    return h


if __name__ == "__main__":
    key = jax.random.PRNGKey(0)
    kx, kp = jax.random.split(key)
    params = init_params(kp)

    # Small batch (serving path): single grid step, fully fused.
    B = 8
    x = jax.random.normal(kx, (B, 1000), dtype=jnp.float32)
    out = hidden_layer_head(x, params)
    jax.block_until_ready(out)
    assert out.shape == (B, 10), out.shape
    ref = reference_head_bf16(x, params)
    assert jnp.allclose(out, ref, atol=2e-2, rtol=2e-2), "mismatch vs bf16 reference"
    # Sanity vs the fp32 PyTorch-equivalent math (bf16 quantization error only).
    ref32 = reference_head_f32(x, params)
    assert jnp.max(jnp.abs(out - ref32)) < 5e-2, "too far from fp32 reference"

    # Non-multiple batch with a tiny tile: exercises the batch grid + padding.
    B2 = 72
    x2 = jax.random.normal(jax.random.fold_in(kx, 1), (B2, 1000), dtype=jnp.float32)
    out2 = hidden_layer_head(x2, params, batch_tile=32)
    jax.block_until_ready(out2)
    assert out2.shape == (B2, 10), out2.shape
    ref2 = reference_head_bf16(x2, params)
    assert jnp.allclose(out2, ref2, atol=2e-2, rtol=2e-2), "mismatch (batch grid)"

    print("KERNEL_OK")
</pallas_src>

<mosaic_0001>
module attributes {stable_mosaic.version = 11 : i64} {
  func.func @mlp_head_kernel(%arg0: i32, %arg1: memref<8x1000xf32, #tpu.memory_space<vmem>>, %arg2: memref<1000x512xbf16, #tpu.memory_space<vmem>>, %arg3: memref<1x512xf32, #tpu.memory_space<vmem>>, %arg4: memref<512x512xbf16, #tpu.memory_space<vmem>>, %arg5: memref<1x512xf32, #tpu.memory_space<vmem>>, %arg6: memref<512x256xbf16, #tpu.memory_space<vmem>>, %arg7: memref<1x256xf32, #tpu.memory_space<vmem>>, %arg8: memref<256x10xbf16, #tpu.memory_space<vmem>>, %arg9: memref<1x10xf32, #tpu.memory_space<vmem>>, %arg10: memref<8x10xf32, #tpu.memory_space<vmem>>) attributes {dimension_semantics = [#tpu.dimension_semantics<arbitrary>], iteration_bounds = array<i64: 1>, scalar_prefetch = 0 : i64, scratch_operands = 0 : i64, tpu.core_type = #tpu.core_type<tc>, window_params = [{transform_indices = @transform_0, window_bounds = array<i64: 8, 1000>}, {pipeline_mode = #tpu.pipeline_mode<synchronous>, transform_indices = @transform_1, window_bounds = array<i64: 1000, 512>}, {pipeline_mode = #tpu.pipeline_mode<synchronous>, transform_indices = @transform_2, window_bounds = array<i64: 1, 512>}, {pipeline_mode = #tpu.pipeline_mode<synchronous>, transform_indices = @transform_3, window_bounds = array<i64: 512, 512>}, {pipeline_mode = #tpu.pipeline_mode<synchronous>, transform_indices = @transform_4, window_bounds = array<i64: 1, 512>}, {pipeline_mode = #tpu.pipeline_mode<synchronous>, transform_indices = @transform_5, window_bounds = array<i64: 512, 256>}, {pipeline_mode = #tpu.pipeline_mode<synchronous>, transform_indices = @transform_6, window_bounds = array<i64: 1, 256>}, {pipeline_mode = #tpu.pipeline_mode<synchronous>, transform_indices = @transform_7, window_bounds = array<i64: 256, 10>}, {pipeline_mode = #tpu.pipeline_mode<synchronous>, transform_indices = @transform_8, window_bounds = array<i64: 1, 10>}, {transform_indices = @transform_9, window_bounds = array<i64: 8, 10>}]} {
    %c0 = arith.constant 0 : index
    %c0_0 = arith.constant 0 : index
    %0 = vector.load %arg1[%c0, %c0_0] : memref<8x1000xf32, #tpu.memory_space<vmem>>, vector<8x1000xf32>
    %1 = arith.truncf %0 : vector<8x1000xf32> to vector<8x1000xbf16>
    %c0_1 = arith.constant 0 : index
    %c0_2 = arith.constant 0 : index
    %2 = vector.load %arg2[%c0_1, %c0_2] : memref<1000x512xbf16, #tpu.memory_space<vmem>>, vector<1000x512xbf16>
    %cst = arith.constant dense<0.000000e+00> : vector<8x512xf32>
    %3 = tpu.matmul %1, %2, %cst {dimension_numbers = #tpu.dot_dimension_numbers<[1], [0], [0], [1], [0, 0, 1, 1], [], []>} : vector<8x1000xbf16>, vector<1000x512xbf16>, vector<8x512xf32> -> vector<8x512xf32>
    %c0_3 = arith.constant 0 : index
    %c0_4 = arith.constant 0 : index
    %4 = vector.load %arg3[%c0_3, %c0_4] : memref<1x512xf32, #tpu.memory_space<vmem>>, vector<1x512xf32>
    %5 = vector.broadcast %4 : vector<1x512xf32> to vector<8x512xf32>
    %6 = arith.addf %3, %5 : vector<8x512xf32>
    %cst_5 = arith.constant 0.00999999977 : f32
    %7 = vector.broadcast %cst_5 : f32 to vector<8x512xf32>
    %8 = arith.mulf %7, %6 : vector<8x512xf32>
    %9 = arith.maximumf %6, %8 : vector<8x512xf32>
    %10 = arith.truncf %9 : vector<8x512xf32> to vector<8x512xbf16>
    %c0_6 = arith.constant 0 : index
    %c0_7 = arith.constant 0 : index
    %11 = vector.load %arg4[%c0_6, %c0_7] : memref<512x512xbf16, #tpu.memory_space<vmem>>, vector<512x512xbf16>
    %cst_8 = arith.constant dense<0.000000e+00> : vector<8x512xf32>
    %12 = tpu.matmul %10, %11, %cst_8 {dimension_numbers = #tpu.dot_dimension_numbers<[1], [0], [0], [1], [0, 0, 1, 1], [], []>} : vector<8x512xbf16>, vector<512x512xbf16>, vector<8x512xf32> -> vector<8x512xf32>
    %c0_9 = arith.constant 0 : index
    %c0_10 = arith.constant 0 : index
    %13 = vector.load %arg5[%c0_9, %c0_10] : memref<1x512xf32, #tpu.memory_space<vmem>>, vector<1x512xf32>
    %14 = vector.broadcast %13 : vector<1x512xf32> to vector<8x512xf32>
    %15 = arith.addf %12, %14 : vector<8x512xf32>
    %cst_11 = arith.constant 0.00999999977 : f32
    %16 = vector.broadcast %cst_11 : f32 to vector<8x512xf32>
    %17 = arith.mulf %16, %15 : vector<8x512xf32>
    %18 = arith.maximumf %15, %17 : vector<8x512xf32>
    %19 = arith.truncf %18 : vector<8x512xf32> to vector<8x512xbf16>
    %c0_12 = arith.constant 0 : index
    %c0_13 = arith.constant 0 : index
    %20 = vector.load %arg6[%c0_12, %c0_13] : memref<512x256xbf16, #tpu.memory_space<vmem>>, vector<512x256xbf16>
    %cst_14 = arith.constant dense<0.000000e+00> : vector<8x256xf32>
    %21 = tpu.matmul %19, %20, %cst_14 {dimension_numbers = #tpu.dot_dimension_numbers<[1], [0], [0], [1], [0, 0, 1, 1], [], []>} : vector<8x512xbf16>, vector<512x256xbf16>, vector<8x256xf32> -> vector<8x256xf32>
    %c0_15 = arith.constant 0 : index
    %c0_16 = arith.constant 0 : index
    %22 = vector.load %arg7[%c0_15, %c0_16] : memref<1x256xf32, #tpu.memory_space<vmem>>, vector<1x256xf32>
    %23 = vector.broadcast %22 : vector<1x256xf32> to vector<8x256xf32>
    %24 = arith.addf %21, %23 : vector<8x256xf32>
    %cst_17 = arith.constant 0.00999999977 : f32
    %25 = vector.broadcast %cst_17 : f32 to vector<8x256xf32>
    %26 = arith.mulf %25, %24 : vector<8x256xf32>
    %27 = arith.maximumf %24, %26 : vector<8x256xf32>
    %28 = arith.truncf %27 : vector<8x256xf32> to vector<8x256xbf16>
    %c0_18 = arith.constant 0 : index
    %c0_19 = arith.constant 0 : index
    %29 = vector.load %arg8[%c0_18, %c0_19] : memref<256x10xbf16, #tpu.memory_space<vmem>>, vector<256x10xbf16>
    %cst_20 = arith.constant dense<0.000000e+00> : vector<8x10xf32>
    %30 = tpu.matmul %28, %29, %cst_20 {dimension_numbers = #tpu.dot_dimension_numbers<[1], [0], [0], [1], [0, 0, 1, 1], [], []>} : vector<8x256xbf16>, vector<256x10xbf16>, vector<8x10xf32> -> vector<8x10xf32>
    %c0_21 = arith.constant 0 : index
    %c0_22 = arith.constant 0 : index
    %31 = vector.load %arg9[%c0_21, %c0_22] : memref<1x10xf32, #tpu.memory_space<vmem>>, vector<1x10xf32>
    %32 = vector.broadcast %31 : vector<1x10xf32> to vector<8x10xf32>
    %33 = arith.addf %30, %32 : vector<8x10xf32>
    %c0_23 = arith.constant 0 : index
    %c0_24 = arith.constant 0 : index
    %34 = vector.load %arg10[%c0_23, %c0_24] : memref<8x10xf32, #tpu.memory_space<vmem>>, vector<8x10xf32>
    tpu.vector_store %arg10[%c0_23, %c0_24], %33 {strides = array<i32>} : memref<8x10xf32, #tpu.memory_space<vmem>>, vector<8x10xf32>,
    return
  }
  func.func @transform_0(%arg0: i32) -> (i32, i32) {
    %c0_i32 = arith.constant 0 : i32
    %c0_i32_0 = arith.constant 0 : i32
    return %arg0, %c0_i32 : i32, i32
  }
  func.func @transform_1(%arg0: i32) -> (i32, i32) {
    %c0_i32 = arith.constant 0 : i32
    %c0_i32_0 = arith.constant 0 : i32
    %c0_i32_1 = arith.constant 0 : i32
    return %c0_i32, %c0_i32_0 : i32, i32
  }
  func.func @transform_2(%arg0: i32) -> (i32, i32) {
    %c0_i32 = arith.constant 0 : i32
    %c0_i32_0 = arith.constant 0 : i32
    %c0_i32_1 = arith.constant 0 : i32
    return %c0_i32, %c0_i32_0 : i32, i32
  }
  func.func @transform_3(%arg0: i32) -> (i32, i32) {
    %c0_i32 = arith.constant 0 : i32
    %c0_i32_0 = arith.constant 0 : i32
    %c0_i32_1 = arith.constant 0 : i32
    return %c0_i32, %c0_i32_0 : i32, i32
  }
  func.func @transform_4(%arg0: i32) -> (i32, i32) {
    %c0_i32 = arith.constant 0 : i32
    %c0_i32_0 = arith.constant 0 : i32
    %c0_i32_1 = arith.constant 0 : i32
    return %c0_i32, %c0_i32_0 : i32, i32
  }
  func.func @transform_5(%arg0: i32) -> (i32, i32) {
    %c0_i32 = arith.constant 0 : i32
    %c0_i32_0 = arith.constant 0 : i32
    %c0_i32_1 = arith.constant 0 : i32
    return %c0_i32, %c0_i32_0 : i32, i32
  }
  func.func @transform_6(%arg0: i32) -> (i32, i32) {
    %c0_i32 = arith.constant 0 : i32
    %c0_i32_0 = arith.constant 0 : i32
    %c0_i32_1 = arith.constant 0 : i32
    return %c0_i32, %c0_i32_0 : i32, i32
  }
  func.func @transform_7(%arg0: i32) -> (i32, i32) {
    %c0_i32 = arith.constant 0 : i32
    %c0_i32_0 = arith.constant 0 : i32
    %c0_i32_1 = arith.constant 0 : i32
    return %c0_i32, %c0_i32_0 : i32, i32
  }
  func.func @transform_8(%arg0: i32) -> (i32, i32) {
    %c0_i32 = arith.constant 0 : i32
    %c0_i32_0 = arith.constant 0 : i32
    %c0_i32_1 = arith.constant 0 : i32
    return %c0_i32, %c0_i32_0 : i32, i32
  }
  func.func @transform_9(%arg0: i32) -> (i32, i32) {
    %c0_i32 = arith.constant 0 : i32
    %c0_i32_0 = arith.constant 0 : i32
    return %arg0, %c0_i32 : i32, i32
  }
}

</mosaic_0001>

<bundles_post_ra>
// kernel: tpu_custom_call.1
= control target key start
LH: loop header
LB: loop body
LE: loop exit
PB: predicated region body
PF: predicated region fallthrough
CT: control target
= control target key end

     0   :  { %14 = vsyncpa [#allocation3], 0  ;;  %s5202_s0 = inlined_call_operand.vmem [shape: f32[8,1000], index: 0, kind: input, shape index: {}]   ;;  %s5203_s1 = inlined_call_operand.hbm [shape: bf16[1000,512], index: 1, kind: input, shape index: {}]   ;;  %s5204_s2 = inlined_call_operand.vmem [shape: f32[1,512], index: 2, kind: input, shape index: {}]   ;;  %s5205_s3 = inlined_call_operand.hbm [shape: bf16[512,512], index: 3, kind: input, shape index: {}]   ;;  %s5206_s4 = inlined_call_operand.vmem [shape: f32[1,512], index: 4, kind: input, shape index: {}]   ;;  %s5207_s5 = inlined_call_operand.hbm [shape: bf16[512,256], index: 5, kind: input, shape index: {}]   ;;  %s5208_s6 = inlined_call_operand.vmem [shape: f32[1,256], index: 6, kind: input, shape index: {}]   ;;  %s5209_s7 = inlined_call_operand.vmem [shape: bf16[256,10], index: 7, kind: input, shape index: {}]   ;;  %s5210_s8 = inlined_call_operand.vmem [shape: f32[1,10], index: 8, kind: input, shape index: {}]   ;;  %s5211_s9 = inlined_call_operand.hbm [shape: f32[8,10], index: 9, kind: output, shape index: {}]  }
   0x1   :  { %15 = vsyncpa [#allocation6], 0 }
   0x2   :  { %16 = vsyncpa [#allocation4], 0  ;;  %s4926_s30 = smov [#allocation5]   ;;  %s4927_s11 = smov [#allocation2]  }
   0x3   :  { %s38_s10 = sshll.u32 %s4926_s30, 4  ;;  %s24_s12 = sshll.u32 %s4927_s11, 4  ;;  %s39_s10 = int_to_ptr.vmem [resolvable:$true] %s38_s10  ;;  %s4984_s12 = int_to_ptr.vmem [resolvable:$true] %s24_s12 }
   0x4   :  { %s4832_s15 = scalar_lea.hbm %s5205_s3, 16384 }
   0x5   :  { %p4833_p0 = scmp.ne.s32.totalorder %s5205_s3, %s4832_s15  ;;  %p4836_p1 = scmp.lt.u32.totalorder %s4832_s15, %s5205_s3 }
   0x7   :  { %p4838_p2 = pnand %p4836_p1, %p4833_p0 }
   0x9   :  { %4841 = shalt.err (!%p4838_p2)
}
   0xa   :  { %s4842_s20 = scalar_lea.vmem %s39_s10, 16384  ;;  %p4847_p4 = scmp.lt.s32.totalorder %s39_s10, %s39_s10 }
   0xb   :  { %p4843_p3 = scmp.ne.s32.totalorder %s39_s10, %s4842_s20  ;;  %p4848_p5 = scmp.lt.s32.totalorder %s4842_s20, %s4842_s20 }
   0xd   :  { %p4849_p6 = por %p4848_p5, %p4847_p4 }
   0xf   :  { %p4850_p7 = pnand %p4849_p6, %p4843_p3 }
  0x11   :  { %4853 = shalt.err (!%p4850_p7)
}
  0x12   :  { %s4928_s21 = smov 256   ;;  %s4929_s22 = smov 16  }
  0x13   :  { %44 = dma.hbm_to_vmem [thread:$0]  %s5205_s3, 16384, %s39_s10, [#allocation6], %s4928_s21, %s4928_s21, %s4929_s22  }
  0x14   :  { %s4854_s27 = scalar_lea.hbm %s5203_s1, 32000 }
  0x15   :  { %p4855_p8 = scmp.ne.s32.totalorder %s5203_s1, %s4854_s27  ;;  %p4858_p9 = scmp.lt.u32.totalorder %s4854_s27, %s5203_s1 }
  0x17   :  { %p4860_p10 = pnand %p4858_p9, %p4855_p8 }
  0x19   :  { %4863 = shalt.err (!%p4860_p10)
}
  0x1a   :  { %s4864_s13 = scalar_lea.vmem %s4984_s12, 32000  ;;  %p4869_p12 = scmp.lt.s32.totalorder %s4984_s12, %s4984_s12 }
  0x1b   :  { %p4865_p11 = scmp.ne.s32.totalorder %s4984_s12, %s4864_s13  ;;  %p4870_p13 = scmp.lt.s32.totalorder %s4864_s13, %s4864_s13 }
  0x1d   :  { %p4871_p0 = por %p4870_p13, %p4869_p12 }
  0x1f   :  { %p4872_p1 = pnand %p4871_p0, %p4865_p11 }
  0x21   :  { %4875 = shalt.err (!%p4872_p1)
}
  0x22   :  { %30 = dma.hbm_to_vmem [thread:$0]  %s5203_s1, 32000, %s4984_s12, [#allocation3], %s4928_s21, %s4928_s21, %s4929_s22  }
  0x23   :  { %s4930_s14 = smov [#allocation7]   ;;  %s4876_s18 = scalar_lea.hbm %s5207_s5, 8192 }
  0x24   :  { %s52_s15 = sshll.u32 %s4930_s14, 4  ;;  %p4877_p2 = scmp.ne.s32.totalorder %s5207_s5, %s4876_s18  ;;  %s53_s15 = int_to_ptr.vmem [resolvable:$true] %s52_s15 }
  0x25   :  { %p4880_p3 = scmp.lt.u32.totalorder %s4876_s18, %s5207_s5 }
  0x27   :  { %p4882_p4 = pnand %p4880_p3, %p4877_p2 }
  0x29   :  { %4885 = shalt.err (!%p4882_p4)
}
  0x2a   :  { %s4886_s25 = scalar_lea.vmem %s53_s15, 8192  ;;  %p4891_p6 = scmp.lt.s32.totalorder %s53_s15, %s53_s15 }
  0x2b   :  { %p4887_p5 = scmp.ne.s32.totalorder %s53_s15, %s4886_s25  ;;  %p4892_p7 = scmp.lt.s32.totalorder %s4886_s25, %s4886_s25 }
  0x2d   :  { %p4893_p8 = por %p4892_p7, %p4891_p6 }
  0x2f   :  { %p4894_p9 = pnand %p4893_p8, %p4887_p5 }
  0x31   :  { %4897 = shalt.err (!%p4894_p9)
}
  0x32   :  { %s4931_s1 = smov 128   ;;  %s4932_s12 = smov 8  }
  0x33   :  { %58 = dma.hbm_to_vmem [thread:$0]  %s5207_s5, 8192, %s53_s15, [#allocation6], %s4931_s1, %s4931_s1, %s4932_s12  }
  0x34   :  { %4920 = dma.done.wait [#allocation3], 32000  }
  0x35   :  { %4921 = vsyncadd [#allocation3], 4294935296 }
  0x36   :  { %4922 = dma.done.wait [#allocation6], 24576  }
  0x37   :  { %4923 = vsyncadd [#allocation6], 4294942720  ;;  %v4152_v0 = vld [vmem:[#allocation2 + $0x4] ss:$16 sps:$4 sm:$0xff]   ;;  %v4156_v2 = vld [vmem:[#allocation2] ss:$16 sps:$4 sm:$0xff]  }
  0x38   :  { %v4154_v1 = vld [vmem:[#allocation2 + $0x604] ss:$16 sps:$4 sm:$0xff]   ;;  %1630 = vmatprep.subr.bf16.mxu0 %v4152_v0  ;;  %v4157_v3 = vld [vmem:[#allocation2 + $0x600] ss:$16 sps:$4 sm:$0xff]   ;;  %v82_v42 = vld [vmem:[%s5202_s0 + $0x38] sm:$0xff]  ;;  %vm1613_vm0 = vcmask 850944  }
  0x39   :  { %1753 = vmatprep.subr.bf16.mxu1 %v4154_v1  ;;  %v4158_v4 = vld [vmem:[#allocation2 + $0x24] ss:$16 sps:$4 sm:$0xff]   ;;  %1631 = vmatpush1.bf16.msra.mxu0 %v4156_v2  ;;  %v4162_v6 = vld [vmem:[#allocation2 + $0x20] ss:$16 sps:$4 sm:$0xff]   ;;  %v5030_v45 = vpack.c.bf16 %v82_v42, %v82_v42  ;;  %v76_v48 = vld [vmem:[%s5202_s0 + $0x8] sm:$0xff]  ;;  %vm1617_vm1 = vcmask 1043456  }
  0x3a   :  { %1754 = vmatpush1.bf16.msra.mxu1 %v4157_v3  ;;  %v4160_v5 = vld [vmem:[#allocation2 + $0x624] ss:$16 sps:$4 sm:$0xff]   ;;  %1632 = vmatprep.subr.bf16.mxu0 %v4158_v4  ;;  %v4163_v7 = vld [vmem:[#allocation2 + $0x620] ss:$16 sps:$4 sm:$0xff]   ;;  %v84_v50 = vpack.c.bf16 %v76_v48, %v76_v48  ;;  %v4245_v4 = vld [vmem:[#allocation2 + $0xc] ss:$16 sps:$4 sm:$0xff]  }
  0x3b   :  { %1755 = vmatprep.subr.bf16.mxu1 %v4160_v5  ;;  %v4164_v8 = vld [vmem:[#allocation2 + $0x44] ss:$16 sps:$4 sm:$0xff]   ;;  %v4168_v10 = vld [vmem:[#allocation2 + $0x40] ss:$16 sps:$4 sm:$0xff]   ;;  %3866 = vmatprep.mubr.msk.bf16.mxu1 %vm1613_vm0, %v5030_v45  ;;  %v4243_v5 = vld [vmem:[#allocation2 + $0x8] ss:$16 sps:$4 sm:$0xff]  }
  0x3c   :  { %v4166_v9 = vld [vmem:[#allocation2 + $0x644] ss:$16 sps:$4 sm:$0xff]   ;;  %v4169_v11 = vld [vmem:[#allocation2 + $0x640] ss:$16 sps:$4 sm:$0xff]   ;;  %1662 = vmatprep.mubr.bf16.mxu0 %v84_v50  ;;  %v4298_v48 = vld [vmem:[#allocation2 + $0x128] ss:$16 sps:$4 sm:$0xff]  }
  0x3d   :  { %1633 = vmatpush1.bf16.msra.mxu0 %v4162_v6  ;;  %v4170_v12 = vld [vmem:[#allocation2 + $0x64] ss:$16 sps:$4 sm:$0xff]   ;;  %v4174_v14 = vld [vmem:[#allocation2 + $0x60] ss:$16 sps:$4 sm:$0xff]   ;;  %s4933_s26 = smov [#allocation8]   ;;  %vm3595_vm2 = vcmask 80896  }
  0x3e   :  { %1756 = vmatpush1.bf16.msra.mxu1 %v4163_v7  ;;  %1634 = vmatprep.subr.bf16.mxu0 %v4164_v8  ;;  %v4172_v13 = vld [vmem:[#allocation2 + $0x664] ss:$16 sps:$4 sm:$0xff]   ;;  %v4175_v15 = vld [vmem:[#allocation2 + $0x660] ss:$16 sps:$4 sm:$0xff]   ;;  %s3603_s27 = sshll.u32 %s4933_s26, 4  ;;  %s3604_s27 = int_to_ptr.vmem [resolvable:$true] %s3603_s27 }
  0x3f   :  { %1757 = vmatprep.subr.bf16.mxu1 %v4166_v9  ;;  %v4176_v16 = vld [vmem:[#allocation2 + $0x84] ss:$16 sps:$4 sm:$0xff]   ;;  %v4180_v18 = vld [vmem:[#allocation2 + $0x80] ss:$16 sps:$4 sm:$0xff]   ;;  %s4898_s28 = scalar_lea.vmem %s3604_s27, 128  ;;  %p4903_p11 = scmp.lt.s32.totalorder %s3604_s27, %s3604_s27 }
  0x40   :  { %v4178_v17 = vld [vmem:[#allocation2 + $0x684] ss:$16 sps:$4 sm:$0xff]   ;;  %v4181_v19 = vld [vmem:[#allocation2 + $0x680] ss:$16 sps:$4 sm:$0xff]   ;;  %p4899_p10 = scmp.ne.s32.totalorder %s3604_s27, %s4898_s28  ;;  %p4904_p12 = scmp.lt.s32.totalorder %s4898_s28, %s4898_s28 }
  0x41   :  { %1635 = vmatpush1.bf16.msra.mxu0 %v4168_v10  ;;  %v4182_v20 = vld [vmem:[#allocation2 + $0xa4] ss:$16 sps:$4 sm:$0xff]   ;;  %v4186_v22 = vld [vmem:[#allocation2 + $0xa0] ss:$16 sps:$4 sm:$0xff]   ;;  %v4252_v10 = vld [vmem:[#allocation2 + $0x2c] ss:$16 sps:$4 sm:$0xff]  }
  0x42   :  { %1758 = vmatpush1.bf16.msra.mxu1 %v4169_v11  ;;  %1636 = vmatprep.subr.bf16.mxu0 %v4170_v12  ;;  %v4184_v21 = vld [vmem:[#allocation2 + $0x6a4] ss:$16 sps:$4 sm:$0xff]   ;;  %v4187_v23 = vld [vmem:[#allocation2 + $0x6a0] ss:$16 sps:$4 sm:$0xff]   ;;  %p4905_p13 = por %p4904_p12, %p4903_p11 }
  0x43   :  { %1759 = vmatprep.subr.bf16.mxu1 %v4172_v13  ;;  %v4188_v24 = vld [vmem:[#allocation2 + $0xc4] ss:$16 sps:$4 sm:$0xff]   ;;  %v4192_v26 = vld [vmem:[#allocation2 + $0xc0] ss:$16 sps:$4 sm:$0xff]   ;;  %v4250_v13 = vld [vmem:[#allocation2 + $0x28] ss:$16 sps:$4 sm:$0xff]  }
  0x44   :  { %v4190_v25 = vld [vmem:[#allocation2 + $0x6c4] ss:$16 sps:$4 sm:$0xff]   ;;  %v4193_v27 = vld [vmem:[#allocation2 + $0x6c0] ss:$16 sps:$4 sm:$0xff]   ;;  %p4906_p0 = pnand %p4905_p13, %p4899_p10 }
  0x45   :  { %1637 = vmatpush1.bf16.msra.mxu0 %v4174_v14  ;;  %v4194_v28 = vld [vmem:[#allocation2 + $0xe4] ss:$16 sps:$4 sm:$0xff]   ;;  %v4198_v30 = vld [vmem:[#allocation2 + $0xe0] ss:$16 sps:$4 sm:$0xff]  }
  0x46   :  { %1760 = vmatpush1.bf16.msra.mxu1 %v4175_v15  ;;  %1638 = vmatprep.subr.bf16.mxu0 %v4176_v16  ;;  %v4196_v29 = vld [vmem:[#allocation2 + $0x6e4] ss:$16 sps:$4 sm:$0xff]   ;;  %v4199_v31 = vld [vmem:[#allocation2 + $0x6e0] ss:$16 sps:$4 sm:$0xff]   ;;  %v4258_v15 = vld [vmem:[#allocation2 + $0x4c] ss:$16 sps:$4 sm:$0xff]  }
  0x47   :  { %1761 = vmatprep.subr.bf16.mxu1 %v4178_v17  ;;  %v4200_v32 = vld [vmem:[#allocation2 + $0x104] ss:$16 sps:$4 sm:$0xff]   ;;  %v4204_v34 = vld [vmem:[#allocation2 + $0x100] ss:$16 sps:$4 sm:$0xff]   ;;  %v4256_v17 = vld [vmem:[#allocation2 + $0x48] ss:$16 sps:$4 sm:$0xff]  }
  0x48   :  { %v4202_v33 = vld [vmem:[#allocation2 + $0x704] ss:$16 sps:$4 sm:$0xff]   ;;  %v4205_v35 = vld [vmem:[#allocation2 + $0x700] ss:$16 sps:$4 sm:$0xff]  }
  0x49   :  { %1639 = vmatpush1.bf16.msra.mxu0 %v4180_v18  ;;  %v4206_v36 = vld [vmem:[#allocation2 + $0x124] ss:$16 sps:$4 sm:$0xff]   ;;  %v4210_v38 = vld [vmem:[#allocation2 + $0x120] ss:$16 sps:$4 sm:$0xff]  }
  0x4a   :  { %1762 = vmatpush1.bf16.msra.mxu1 %v4181_v19  ;;  %1640 = vmatprep.subr.bf16.mxu0 %v4182_v20  ;;  %v4208_v37 = vld [vmem:[#allocation2 + $0x724] ss:$16 sps:$4 sm:$0xff]   ;;  %v4211_v39 = vld [vmem:[#allocation2 + $0x720] ss:$16 sps:$4 sm:$0xff]   ;;  %v4264_v19 = vld [vmem:[#allocation2 + $0x6c] ss:$16 sps:$4 sm:$0xff]  }
  0x4b   :  { %1763 = vmatprep.subr.bf16.mxu1 %v4184_v21  ;;  %v4212_v40 = vld [vmem:[#allocation2 + $0x144] ss:$16 sps:$4 sm:$0xff]   ;;  %v4216_v43 = vld [vmem:[#allocation2 + $0x140] ss:$16 sps:$4 sm:$0xff]   ;;  %v4262_v21 = vld [vmem:[#allocation2 + $0x68] ss:$16 sps:$4 sm:$0xff]  }
  0x4c   :  { %v4214_v41 = vld [vmem:[#allocation2 + $0x744] ss:$16 sps:$4 sm:$0xff]   ;;  %v4217_v44 = vld [vmem:[#allocation2 + $0x740] ss:$16 sps:$4 sm:$0xff]  }
  0x4d   :  { %1641 = vmatpush1.bf16.msra.mxu0 %v4186_v22  ;;  %v4218_v46 = vld [vmem:[#allocation2 + $0x164] ss:$16 sps:$4 sm:$0xff]   ;;  %v4222_v49 = vld [vmem:[#allocation2 + $0x160] ss:$16 sps:$4 sm:$0xff]  }
  0x4e   :  { %1764 = vmatpush1.bf16.msra.mxu1 %v4187_v23  ;;  %1642 = vmatprep.subr.bf16.mxu0 %v4188_v24  ;;  %v4220_v47 = vld [vmem:[#allocation2 + $0x764] ss:$16 sps:$4 sm:$0xff]   ;;  %v4223_v51 = vld [vmem:[#allocation2 + $0x760] ss:$16 sps:$4 sm:$0xff]   ;;  %v4270_v23 = vld [vmem:[#allocation2 + $0x8c] ss:$16 sps:$4 sm:$0xff]  }
  0x4f   :  { %1765 = vmatprep.subr.bf16.mxu1 %v4190_v25  ;;  %v4224_v52 = vld [vmem:[#allocation2 + $0x184] ss:$16 sps:$4 sm:$0xff]   ;;  %v4228_v54 = vld [vmem:[#allocation2 + $0x180] ss:$16 sps:$4 sm:$0xff]   ;;  %v4268_v25 = vld [vmem:[#allocation2 + $0x88] ss:$16 sps:$4 sm:$0xff]  }
  0x50   :  { %v4226_v53 = vld [vmem:[#allocation2 + $0x784] ss:$16 sps:$4 sm:$0xff]   ;;  %v4229_v55 = vld [vmem:[#allocation2 + $0x780] ss:$16 sps:$4 sm:$0xff]  }
  0x51   :  { %1643 = vmatpush1.bf16.msra.mxu0 %v4192_v26  ;;  %v4230_v56 = vld [vmem:[#allocation2 + $0x1a4] ss:$16 sps:$4 sm:$0xff]   ;;  %v4234_v59 = vld [vmem:[#allocation2 + $0x1a0] ss:$16 sps:$4 sm:$0xff]  }
  0x52   :  { %1766 = vmatpush1.bf16.msra.mxu1 %v4193_v27  ;;  %1644 = vmatprep.subr.bf16.mxu0 %v4194_v28  ;;  %v4232_v57 = vld [vmem:[#allocation2 + $0x7a4] ss:$16 sps:$4 sm:$0xff]   ;;  %v4235_v60 = vld [vmem:[#allocation2 + $0x7a0] ss:$16 sps:$4 sm:$0xff]   ;;  %v4276_v27 = vld [vmem:[#allocation2 + $0xac] ss:$16 sps:$4 sm:$0xff]  }
  0x53   :  { %1767 = vmatprep.subr.bf16.mxu1 %v4196_v29  ;;  %v339_v58 = vld [vmem:[#allocation2 + $0x7c0] sm:$0xff]  ;;  %v81_v1 = vld [vmem:[%s5202_s0 + $0x30] sm:$0xff]  ;;  %v4274_v29 = vld [vmem:[#allocation2 + $0xa8] ss:$16 sps:$4 sm:$0xff]  }
  0x54   :  { %v4236_v61 = vld [vmem:[#allocation2 + $0x1c4] ss:$16 sps:$4 sm:$0xff]   ;;  %v3862_v62 = vcombine.high %v339_v58, %v339_v58  ;;  %v3861_v63 = vcombine.low %v339_v58, %v339_v58  ;;  %v4239_v0 = vld [vmem:[#allocation2 + $0x1c0] ss:$16 sps:$4 sm:$0xff]   ;;  %v5042_v6 = vpack.c.bf16 %v81_v1, %v81_v1  ;;  %v4318_v58 = vld [vmem:[#allocation2 + $0x18c] ss:$16 sps:$4 sm:$0xff]  }
  0x55   :  { %1645 = vmatpush1.bf16.msra.mxu0 %v4198_v30  ;;  %v4241_v3 = vld [vmem:[#allocation2 + $0x1e4] ss:$16 sps:$4 sm:$0xff]   ;;  %v4246_v7 = vld [vmem:[#allocation2 + $0x1e0] ss:$16 sps:$4 sm:$0xff]  }
  0x56   :  { %1768 = vmatpush1.bf16.msra.mxu1 %v4199_v31  ;;  %1646 = vmatprep.subr.bf16.mxu0 %v4200_v32  ;;  %v1619_v2 = vsel %vm1617_vm1, %v3861_v63, 0  ;;  %v75_v8 = vld [vmem:[%s5202_s0] sm:$0xff]  ;;  %v4282_v31 = vld [vmem:[#allocation2 + $0xcc] ss:$16 sps:$4 sm:$0xff]  }
  0x57   :  { %1769 = vmatprep.subr.bf16.mxu1 %v4202_v33  ;;  %v4249_v9 = vld [vmem:[#allocation2 + $0x204] ss:$16 sps:$4 sm:$0xff]   ;;  %v4247_v11 = vld [vmem:[#allocation2 + $0x200] ss:$16 sps:$4 sm:$0xff]   ;;  %v5048_v12 = vpack.c.bf16 %v75_v8, %v75_v8  ;;  %v4280_v33 = vld [vmem:[#allocation2 + $0xc8] ss:$16 sps:$4 sm:$0xff]  }
  0x58   :  { %v4255_v14 = vld [vmem:[#allocation2 + $0x224] ss:$16 sps:$4 sm:$0xff]   ;;  %v4253_v16 = vld [vmem:[#allocation2 + $0x220] ss:$16 sps:$4 sm:$0xff]  }
  0x59   :  { %1647 = vmatpush1.bf16.msra.mxu0 %v4204_v34  ;;  %v4261_v18 = vld [vmem:[#allocation2 + $0x244] ss:$16 sps:$4 sm:$0xff]   ;;  %v4259_v20 = vld [vmem:[#allocation2 + $0x240] ss:$16 sps:$4 sm:$0xff]  }
  0x5a   :  { %1770 = vmatpush1.bf16.msra.mxu1 %v4205_v35  ;;  %1648 = vmatprep.subr.bf16.mxu0 %v4206_v36  ;;  %v4267_v22 = vld [vmem:[#allocation2 + $0x264] ss:$16 sps:$4 sm:$0xff]   ;;  %v4265_v24 = vld [vmem:[#allocation2 + $0x260] ss:$16 sps:$4 sm:$0xff]   ;;  %v4288_v35 = vld [vmem:[#allocation2 + $0xec] ss:$16 sps:$4 sm:$0xff]  }
  0x5b   :  { %1771 = vmatprep.subr.bf16.mxu1 %v4208_v37  ;;  %v4273_v26 = vld [vmem:[#allocation2 + $0x284] ss:$16 sps:$4 sm:$0xff]   ;;  %v4271_v28 = vld [vmem:[#allocation2 + $0x280] ss:$16 sps:$4 sm:$0xff]   ;;  %v78_v36 = vld [vmem:[%s5202_s0 + $0x18] sm:$0xff] }
  0x5c   :  { %v4279_v30 = vld [vmem:[#allocation2 + $0x2a4] ss:$16 sps:$4 sm:$0xff]   ;;  %v4277_v32 = vld [vmem:[#allocation2 + $0x2a0] ss:$16 sps:$4 sm:$0xff]   ;;  %v5054_v37 = vpack.c.bf16 %v78_v36, %v78_v36 }
  0x5d   :  { %1649 = vmatpush1.bf16.msra.mxu0 %v4210_v38  ;;  %v4285_v34 = vld [vmem:[#allocation2 + $0x2c4] ss:$16 sps:$4 sm:$0xff]   ;;  %v4283_v38 = vld [vmem:[#allocation2 + $0x2c0] ss:$16 sps:$4 sm:$0xff]  }
  0x5e   :  { %1772 = vmatpush1.bf16.msra.mxu1 %v4211_v39  ;;  %1650 = vmatprep.subr.bf16.mxu0 %v4212_v40  ;;  %v4286_v39 = vld [vmem:[#allocation2 + $0xe8] ss:$16 sps:$4 sm:$0xff]   ;;  %v4291_v40 = vld [vmem:[#allocation2 + $0x2e4] ss:$16 sps:$4 sm:$0xff]   ;;  %v4289_v42 = vld [vmem:[#allocation2 + $0x2e0] ss:$16 sps:$4 sm:$0xff]  }
  0x5f   :  { %1773 = vmatprep.subr.bf16.mxu1 %v4214_v41  ;;  %v4294_v41 = vld [vmem:[#allocation2 + $0x10c] ss:$16 sps:$4 sm:$0xff]   ;;  %v4319_v63 = vld [vmem:[#allocation2 + $0x380] ss:$16 sps:$4 sm:$0xff]   ;;  %v4327_v1 = vld [vmem:[#allocation2 + $0x3a4] ss:$16 sps:$4 sm:$0xff]  }
  0x60   :  { %v4331_v8 = vld [vmem:[#allocation2 + $0x3c0] ss:$16 sps:$4 sm:$0xff]  }
  0x61   :  { %1651 = vmatpush1.bf16.msra.mxu0 %v4216_v43  ;;  %v4292_v43 = vld [vmem:[#allocation2 + $0x108] ss:$16 sps:$4 sm:$0xff]   ;;  %v4367_v36 = vld [vmem:[#allocation2 + $0x480] ss:$16 sps:$4 sm:$0xff]  }
  0x62   :  { %1774 = vmatpush1.bf16.msra.mxu1 %v4217_v44  ;;  %1652 = vmatprep.subr.bf16.mxu0 %v4218_v46  ;;  %v4297_v44 = vld [vmem:[#allocation2 + $0x304] ss:$16 sps:$4 sm:$0xff]   ;;  %v4300_v46 = vld [vmem:[#allocation2 + $0x12c] ss:$16 sps:$4 sm:$0xff]  }
  0x63   :  { %1775 = vmatprep.subr.bf16.mxu1 %v4220_v47  ;;  %v4295_v47 = vld [vmem:[#allocation2 + $0x300] ss:$16 sps:$4 sm:$0xff]  }
  0x65   :  { %1653 = vmatpush1.bf16.msra.mxu0 %v4222_v49  ;;  %v4303_v49 = vld [vmem:[#allocation2 + $0x324] ss:$16 sps:$4 sm:$0xff]  }
  0x66   :  { %1776 = vmatpush1.bf16.msra.mxu1 %v4223_v51  ;;  %1654 = vmatprep.subr.bf16.mxu0 %v4224_v52  ;;  %v4301_v51 = vld [vmem:[#allocation2 + $0x320] ss:$16 sps:$4 sm:$0xff]   ;;  %v4304_v52 = vld [vmem:[#allocation2 + $0x148] ss:$16 sps:$4 sm:$0xff]  }
  0x67   :  { %1777 = vmatprep.subr.bf16.mxu1 %v4226_v53  ;;  %v4309_v53 = vld [vmem:[#allocation2 + $0x344] ss:$16 sps:$4 sm:$0xff]  }
  0x69   :  { %1655 = vmatpush1.bf16.msra.mxu0 %v4228_v54  ;;  %v4312_v54 = vld [vmem:[#allocation2 + $0x16c] ss:$16 sps:$4 sm:$0xff]  }
  0x6a   :  { %1778 = vmatpush1.bf16.msra.mxu1 %v4229_v55  ;;  %1656 = vmatprep.subr.bf16.mxu0 %v4230_v56  ;;  %v4307_v55 = vld [vmem:[#allocation2 + $0x340] ss:$16 sps:$4 sm:$0xff]   ;;  %v4310_v56 = vld [vmem:[#allocation2 + $0x168] ss:$16 sps:$4 sm:$0xff]  }
  0x6b   :  { %1779 = vmatprep.subr.bf16.mxu1 %v4232_v57  ;;  %v4315_v57 = vld [vmem:[#allocation2 + $0x364] ss:$16 sps:$4 sm:$0xff]  }
  0x6d   :  { %1657 = vmatpush1.bf16.msra.mxu0 %v4234_v59  ;;  %v4313_v59 = vld [vmem:[#allocation2 + $0x360] ss:$16 sps:$4 sm:$0xff]  }
  0x6e   :  { %1780 = vmatpush1.bf16.msra.mxu1 %v4235_v60  ;;  %1658 = vmatprep.subr.bf16.mxu0 %v4236_v61  ;;  %v4316_v60 = vld [vmem:[#allocation2 + $0x188] ss:$16 sps:$4 sm:$0xff]   ;;  %v4321_v61 = vld [vmem:[#allocation2 + $0x384] ss:$16 sps:$4 sm:$0xff]  }
  0x6f   :  { %3865 = vmatprep.subr.msk.bf16.mxu1 %vm1617_vm1, %v3862_v62  ;;  %v4324_v62 = vld [vmem:[#allocation2 + $0x1ac] ss:$16 sps:$4 sm:$0xff]  }
  0x71   :  { %1659 = vmatpush1.bf16.msra.mxu0 %v4239_v0  ;;  %v4322_v0 = vld [vmem:[#allocation2 + $0x1a8] ss:$16 sps:$4 sm:$0xff]  }
  0x72   :  { %1782 = vmatpush1.bf16.msra.mxu1 %v1619_v2  ;;  %1660 = vmatprep.subr.bf16.mxu0 %v4241_v3  ;;  %v4330_v2 = vld [vmem:[#allocation2 + $0x1cc] ss:$16 sps:$4 sm:$0xff]   ;;  %v4325_v3 = vld [vmem:[#allocation2 + $0x3a0] ss:$16 sps:$4 sm:$0xff]  }
  0x73   :  { %1794 = vmatprep.subr.bf16.mxu1 %v4245_v4  ;;  %v4328_v4 = vld [vmem:[#allocation2 + $0x1c8] ss:$16 sps:$4 sm:$0xff]  }
  0x75   :  { %1786 = vmatmul.mubr.bf16.vlgmr.msra.gmra.mrb[0].mxu1 %v5042_v6  ;;  %1661 = vmatpush1.bf16.msra.mxu0 %v4246_v7  ;;  %v4336_v7 = vld [vmem:[#allocation2 + $0x1ec] ss:$16 sps:$4 sm:$0xff]  }
  0x76   :  { %1795 = vmatpush1.bf16.msra.mxu1 %v4243_v5  ;;  %1671 = vmatprep.subr.bf16.mxu0 %v4249_v9  ;;  %v4333_v5 = vld [vmem:[#allocation2 + $0x3c4] ss:$16 sps:$4 sm:$0xff]   ;;  %v4334_v9 = vld [vmem:[#allocation2 + $0x1e8] ss:$16 sps:$4 sm:$0xff]  }
  0x77   :  { %1796 = vmatprep.subr.bf16.mxu1 %v4252_v10  ;;  %1826 = vmatprep.mubr.bf16.mxu1 %v84_v50  ;;  %v4306_v50 = vld [vmem:[#allocation2 + $0x14c] ss:$16 sps:$4 sm:$0xff]   ;;  %v4339_v10 = vld [vmem:[#allocation2 + $0x3e4] ss:$16 sps:$4 sm:$0xff]  }
  0x78   :  { %1663 = vmatmul.mubr.bf16.vlgmr.msra.gmra.mrb[0].mxu0 %v5048_v12 }
  0x79   :  { %1672 = vmatpush1.bf16.msra.mxu0 %v4247_v11  ;;  %1703 = vmatprep.mubr.bf16.mxu0 %v5054_v37  ;;  %v4342_v11 = vld [vmem:[#allocation2 + $0x20c] ss:$16 sps:$4 sm:$0xff]  }
  0x7a   :  { %1797 = vmatpush1.bf16.msra.mxu1 %v4250_v13  ;;  %1673 = vmatprep.subr.bf16.mxu0 %v4255_v14  ;;  %v4337_v13 = vld [vmem:[#allocation2 + $0x3e0] ss:$16 sps:$4 sm:$0xff]   ;;  %v4340_v14 = vld [vmem:[#allocation2 + $0x208] ss:$16 sps:$4 sm:$0xff]  }
  0x7b   :  { %1798 = vmatprep.subr.bf16.mxu1 %v4258_v15  ;;  %v4345_v15 = vld [vmem:[#allocation2 + $0x404] ss:$16 sps:$4 sm:$0xff]  }
  0x7d   :  { %1674 = vmatpush1.bf16.msra.mxu0 %v4253_v16  ;;  %v77_v16 = vld [vmem:[%s5202_s0 + $0x10] sm:$0xff] }
  0x7e   :  { %1799 = vmatpush1.bf16.msra.mxu1 %v4256_v17  ;;  %1675 = vmatprep.subr.bf16.mxu0 %v4261_v18  ;;  %v4348_v17 = vld [vmem:[#allocation2 + $0x22c] ss:$16 sps:$4 sm:$0xff]   ;;  %v4343_v18 = vld [vmem:[#allocation2 + $0x400] ss:$16 sps:$4 sm:$0xff]  }
  0x7f   :  { %1800 = vmatprep.subr.bf16.mxu1 %v4264_v19  ;;  %v5061_v19 = vpack.c.bf16 %v77_v16, %v77_v16  ;;  %v4430_v16 = vld [vmem:[#allocation2 + $0x3e8] ss:$16 sps:$4 sm:$0xff]  }
  0x81   :  { %1676 = vmatpush1.bf16.msra.mxu0 %v4259_v20  ;;  %v4346_v20 = vld [vmem:[#allocation2 + $0x228] ss:$16 sps:$4 sm:$0xff]  }
  0x82   :  { %1801 = vmatpush1.bf16.msra.mxu1 %v4262_v21  ;;  %1677 = vmatprep.subr.bf16.mxu0 %v4267_v22  ;;  %v4351_v21 = vld [vmem:[#allocation2 + $0x424] ss:$16 sps:$4 sm:$0xff]   ;;  %v4354_v22 = vld [vmem:[#allocation2 + $0x24c] ss:$16 sps:$4 sm:$0xff]  }
  0x83   :  { %1802 = vmatprep.subr.bf16.mxu1 %v4270_v23  ;;  %v80_v23 = vld [vmem:[%s5202_s0 + $0x28] sm:$0xff] }
  0x85   :  { %1678 = vmatpush1.bf16.msra.mxu0 %v4265_v24  ;;  %v5067_v24 = vpack.c.bf16 %v80_v23, %v80_v23  ;;  %v4441_v23 = vld [vmem:[#allocation2 + $0x42c] ss:$16 sps:$4 sm:$0xff]  }
  0x86   :  { %1803 = vmatpush1.bf16.msra.mxu1 %v4268_v25  ;;  %1679 = vmatprep.subr.bf16.mxu0 %v4273_v26  ;;  %v4352_v25 = vld [vmem:[#allocation2 + $0x248] ss:$16 sps:$4 sm:$0xff]   ;;  %v4357_v26 = vld [vmem:[#allocation2 + $0x444] ss:$16 sps:$4 sm:$0xff]  }
  0x87   :  { %1804 = vmatprep.subr.bf16.mxu1 %v4276_v27  ;;  %v4360_v27 = vld [vmem:[#allocation2 + $0x26c] ss:$16 sps:$4 sm:$0xff]  }
  0x89   :  { %1680 = vmatpush1.bf16.msra.mxu0 %v4271_v28  ;;  %v4355_v28 = vld [vmem:[#allocation2 + $0x440] ss:$16 sps:$4 sm:$0xff]  }
  0x8a   :  { %1805 = vmatpush1.bf16.msra.mxu1 %v4274_v29  ;;  %1681 = vmatprep.subr.bf16.mxu0 %v4279_v30  ;;  %v4358_v29 = vld [vmem:[#allocation2 + $0x268] ss:$16 sps:$4 sm:$0xff]   ;;  %v4363_v30 = vld [vmem:[#allocation2 + $0x464] ss:$16 sps:$4 sm:$0xff]  }
  0x8b   :  { %1806 = vmatprep.subr.bf16.mxu1 %v4282_v31  ;;  %v4366_v31 = vld [vmem:[#allocation2 + $0x28c] ss:$16 sps:$4 sm:$0xff]  }
  0x8d   :  { %1682 = vmatpush1.bf16.msra.mxu0 %v4277_v32  ;;  %v4361_v32 = vld [vmem:[#allocation2 + $0x460] ss:$16 sps:$4 sm:$0xff]  }
  0x8e   :  { %1807 = vmatpush1.bf16.msra.mxu1 %v4280_v33  ;;  %1683 = vmatprep.subr.bf16.mxu0 %v4285_v34  ;;  %v4364_v33 = vld [vmem:[#allocation2 + $0x288] ss:$16 sps:$4 sm:$0xff]   ;;  %v4369_v34 = vld [vmem:[#allocation2 + $0x484] ss:$16 sps:$4 sm:$0xff]  }
  0x8f   :  { %1808 = vmatprep.subr.bf16.mxu1 %v4288_v35  ;;  %v4372_v35 = vld [vmem:[#allocation2 + $0x2ac] ss:$16 sps:$4 sm:$0xff]  }
  0x91   :  { %1684 = vmatpush1.bf16.msra.mxu0 %v4283_v38  ;;  %v4375_v38 = vld [vmem:[#allocation2 + $0x4a4] ss:$16 sps:$4 sm:$0xff]  }
  0x92   :  { %1809 = vmatpush1.bf16.msra.mxu1 %v4286_v39  ;;  %1685 = vmatprep.subr.bf16.mxu0 %v4291_v40  ;;  %v4378_v39 = vld [vmem:[#allocation2 + $0x2cc] ss:$16 sps:$4 sm:$0xff]   ;;  %v4373_v40 = vld [vmem:[#allocation2 + $0x4a0] ss:$16 sps:$4 sm:$0xff]  }
  0x93   :  { %1810 = vmatprep.subr.bf16.mxu1 %v4294_v41  ;;  %v4376_v41 = vld [vmem:[#allocation2 + $0x2c8] ss:$16 sps:$4 sm:$0xff]  }
  0x95   :  { %1686 = vmatpush1.bf16.msra.mxu0 %v4289_v42  ;;  %v4381_v42 = vld [vmem:[#allocation2 + $0x4c4] ss:$16 sps:$4 sm:$0xff]  }
  0x96   :  { %1811 = vmatpush1.bf16.msra.mxu1 %v4292_v43  ;;  %1687 = vmatprep.subr.bf16.mxu0 %v4297_v44  ;;  %v4384_v43 = vld [vmem:[#allocation2 + $0x2ec] ss:$16 sps:$4 sm:$0xff]   ;;  %v4379_v44 = vld [vmem:[#allocation2 + $0x4c0] ss:$16 sps:$4 sm:$0xff]  }
  0x97   :  { %1812 = vmatprep.subr.bf16.mxu1 %v4300_v46  ;;  %v4382_v46 = vld [vmem:[#allocation2 + $0x2e8] ss:$16 sps:$4 sm:$0xff]  }
  0x99   :  { %1688 = vmatpush1.bf16.msra.mxu0 %v4295_v47  ;;  %v4387_v47 = vld [vmem:[#allocation2 + $0x4e4] ss:$16 sps:$4 sm:$0xff]  }
  0x9a   :  { %1813 = vmatpush1.bf16.msra.mxu1 %v4298_v48  ;;  %1689 = vmatprep.subr.bf16.mxu0 %v4303_v49  ;;  %v4390_v48 = vld [vmem:[#allocation2 + $0x30c] ss:$16 sps:$4 sm:$0xff]   ;;  %v4385_v49 = vld [vmem:[#allocation2 + $0x4e0] ss:$16 sps:$4 sm:$0xff]  }
  0x9b   :  { %1814 = vmatprep.subr.bf16.mxu1 %v4306_v50  ;;  %v4388_v50 = vld [vmem:[#allocation2 + $0x308] ss:$16 sps:$4 sm:$0xff]  }
  0x9d   :  { %1690 = vmatpush1.bf16.msra.mxu0 %v4301_v51  ;;  %v4393_v51 = vld [vmem:[#allocation2 + $0x504] ss:$16 sps:$4 sm:$0xff]  }
  0x9e   :  { %1815 = vmatpush1.bf16.msra.mxu1 %v4304_v52  ;;  %1691 = vmatprep.subr.bf16.mxu0 %v4309_v53  ;;  %v4396_v52 = vld [vmem:[#allocation2 + $0x32c] ss:$16 sps:$4 sm:$0xff]   ;;  %v4391_v53 = vld [vmem:[#allocation2 + $0x500] ss:$16 sps:$4 sm:$0xff]  }
  0x9f   :  { %1816 = vmatprep.subr.bf16.mxu1 %v4312_v54  ;;  %v4394_v54 = vld [vmem:[#allocation2 + $0x328] ss:$16 sps:$4 sm:$0xff]  }
  0xa1   :  { %1692 = vmatpush1.bf16.msra.mxu0 %v4307_v55  ;;  %v4399_v55 = vld [vmem:[#allocation2 + $0x524] ss:$16 sps:$4 sm:$0xff]  }
  0xa2   :  { %1817 = vmatpush1.bf16.msra.mxu1 %v4310_v56  ;;  %1693 = vmatprep.subr.bf16.mxu0 %v4315_v57  ;;  %v4402_v56 = vld [vmem:[#allocation2 + $0x34c] ss:$16 sps:$4 sm:$0xff]   ;;  %v4397_v57 = vld [vmem:[#allocation2 + $0x520] ss:$16 sps:$4 sm:$0xff]  }
  0xa3   :  { %1818 = vmatprep.subr.bf16.mxu1 %v4318_v58  ;;  %v4400_v58 = vld [vmem:[#allocation2 + $0x348] ss:$16 sps:$4 sm:$0xff]  }
  0xa5   :  { %1694 = vmatpush1.bf16.msra.mxu0 %v4313_v59  ;;  %v4405_v59 = vld [vmem:[#allocation2 + $0x544] ss:$16 sps:$4 sm:$0xff]  }
  0xa6   :  { %1819 = vmatpush1.bf16.msra.mxu1 %v4316_v60  ;;  %1695 = vmatprep.subr.bf16.mxu0 %v4321_v61  ;;  %v4408_v60 = vld [vmem:[#allocation2 + $0x36c] ss:$16 sps:$4 sm:$0xff]   ;;  %v4403_v61 = vld [vmem:[#allocation2 + $0x540] ss:$16 sps:$4 sm:$0xff]  }
  0xa7   :  { %1820 = vmatprep.subr.bf16.mxu1 %v4324_v62  ;;  %v4406_v62 = vld [vmem:[#allocation2 + $0x368] ss:$16 sps:$4 sm:$0xff]  }
  0xa9   :  { %1696 = vmatpush1.bf16.msra.mxu0 %v4319_v63  ;;  %v4411_v63 = vld [vmem:[#allocation2 + $0x564] ss:$16 sps:$4 sm:$0xff]  }
  0xaa   :  { %1821 = vmatpush1.bf16.msra.mxu1 %v4322_v0  ;;  %1697 = vmatprep.subr.bf16.mxu0 %v4327_v1  ;;  %v4414_v0 = vld [vmem:[#allocation2 + $0x38c] ss:$16 sps:$4 sm:$0xff]   ;;  %v4409_v1 = vld [vmem:[#allocation2 + $0x560] ss:$16 sps:$4 sm:$0xff]  }
  0xab   :  { %1822 = vmatprep.subr.bf16.mxu1 %v4330_v2  ;;  %v4412_v2 = vld [vmem:[#allocation2 + $0x388] ss:$16 sps:$4 sm:$0xff]  }
  0xad   :  { %1698 = vmatpush1.bf16.msra.mxu0 %v4325_v3  ;;  %v4417_v3 = vld [vmem:[#allocation2 + $0x584] ss:$16 sps:$4 sm:$0xff]  }
  0xae   :  { %1823 = vmatpush1.bf16.msra.mxu1 %v4328_v4  ;;  %1699 = vmatprep.subr.bf16.mxu0 %v4333_v5  ;;  %v4420_v4 = vld [vmem:[#allocation2 + $0x3ac] ss:$16 sps:$4 sm:$0xff]   ;;  %v4415_v5 = vld [vmem:[#allocation2 + $0x580] ss:$16 sps:$4 sm:$0xff]  }
  0xaf   :  { %1824 = vmatprep.subr.bf16.mxu1 %v4336_v7  ;;  %v4418_v7 = vld [vmem:[#allocation2 + $0x3a8] ss:$16 sps:$4 sm:$0xff]  }
  0xb1   :  { %1700 = vmatpush1.bf16.msra.mxu0 %v4331_v8  ;;  %v4423_v8 = vld [vmem:[#allocation2 + $0x5a4] ss:$16 sps:$4 sm:$0xff]  }
  0xb2   :  { %1825 = vmatpush1.bf16.msra.mxu1 %v4334_v9  ;;  %1701 = vmatprep.subr.bf16.mxu0 %v4339_v10  ;;  %v4426_v9 = vld [vmem:[#allocation2 + $0x3cc] ss:$16 sps:$4 sm:$0xff]   ;;  %v4421_v10 = vld [vmem:[#allocation2 + $0x5a0] ss:$16 sps:$4 sm:$0xff]  }
  0xb3   :  { %1835 = vmatprep.subr.bf16.mxu1 %v4342_v11  ;;  %v4424_v11 = vld [vmem:[#allocation2 + $0x3c8] ss:$16 sps:$4 sm:$0xff]  }
  0xb5   :  { %1827 = vmatmul.mubr.bf16.vlgmr.msra.gmra.mrb[4].mxu1 %v5048_v12  ;;  %1702 = vmatpush1.bf16.msra.mxu0 %v4337_v13  ;;  %v4349_v12 = vld [vmem:[#allocation2 + $0x420] ss:$16 sps:$4 sm:$0xff]   ;;  %v4429_v13 = vld [vmem:[#allocation2 + $0x5c4] ss:$16 sps:$4 sm:$0xff]  }
  0xb6   :  { %1836 = vmatpush1.bf16.msra.mxu1 %v4340_v14  ;;  %1712 = vmatprep.subr.bf16.mxu0 %v4345_v15  ;;  %v4432_v14 = vld [vmem:[#allocation2 + $0x3ec] ss:$16 sps:$4 sm:$0xff]   ;;  %v4427_v15 = vld [vmem:[#allocation2 + $0x5c0] ss:$16 sps:$4 sm:$0xff]  }
  0xb7   :  { %1837 = vmatprep.subr.bf16.mxu1 %v4348_v17  ;;  %1867 = vmatprep.mubr.bf16.mxu1 %v5054_v37  ;;  %v4370_v37 = vld [vmem:[#allocation2 + $0x2a8] ss:$16 sps:$4 sm:$0xff]   ;;  %v4435_v17 = vld [vmem:[#allocation2 + $0x5e4] ss:$16 sps:$4 sm:$0xff]  }
  0xb8   :  { %1704 = vmatmul.mubr.bf16.vlgmr.msra.gmra.mrb[0].mxu0 %v5061_v19 }
  0xb9   :  { %1713 = vmatpush1.bf16.msra.mxu0 %v4343_v18  ;;  %1744 = vmatprep.mubr.bf16.mxu0 %v5067_v24  ;;  %v4438_v18 = vld [vmem:[#allocation2 + $0x40c] ss:$16 sps:$4 sm:$0xff]  }
  0xba   :  { %1838 = vmatpush1.bf16.msra.mxu1 %v4346_v20  ;;  %1714 = vmatprep.subr.bf16.mxu0 %v4351_v21  ;;  %v4433_v20 = vld [vmem:[#allocation2 + $0x5e0] ss:$16 sps:$4 sm:$0xff]   ;;  %v4436_v21 = vld [vmem:[#allocation2 + $0x408] ss:$16 sps:$4 sm:$0xff]  }
  0xbb   :  { %1839 = vmatprep.subr.bf16.mxu1 %v4354_v22  ;;  %v79_v22 = vld [vmem:[%s5202_s0 + $0x20] sm:$0xff] }
  0xbd   :  { %1715 = vmatpush1.bf16.msra.mxu0 %v4349_v12  ;;  %v4530_v12 = vld [vmem:[#allocation5 + $0x4] ss:$16 sps:$4 sm:$0xff]  }
  0xbe   :  { %1840 = vmatpush1.bf16.msra.mxu1 %v4352_v25  ;;  %1716 = vmatprep.subr.bf16.mxu0 %v4357_v26  ;;  %v5075_v25 = vpack.c.bf16 %v79_v22, %v79_v22  ;;  %v4439_v26 = vld [vmem:[#allocation2 + $0x428] ss:$16 sps:$4 sm:$0xff]   ;;  %v4492_v22 = vld [vmem:[#allocation2 + $0x64c] ss:$16 sps:$4 sm:$0xff]  }
  0xbf   :  { %1841 = vmatprep.subr.bf16.mxu1 %v4360_v27  ;;  %v4444_v27 = vld [vmem:[#allocation2 + $0x44c] ss:$16 sps:$4 sm:$0xff]  }
  0xc1   :  { %1717 = vmatpush1.bf16.msra.mxu0 %v4355_v28  ;;  %v4528_v28 = vld [vmem:[#allocation5] ss:$16 sps:$4 sm:$0xff]  }
  0xc2   :  { %1842 = vmatpush1.bf16.msra.mxu1 %v4358_v29  ;;  %1718 = vmatprep.subr.bf16.mxu0 %v4363_v30  ;;  %v4536_v29 = vld [vmem:[#allocation5 + $0x24] ss:$16 sps:$4 sm:$0xff]   ;;  %v4442_v30 = vld [vmem:[#allocation2 + $0x448] ss:$16 sps:$4 sm:$0xff]  }
  0xc3   :  { %1843 = vmatprep.subr.bf16.mxu1 %v4366_v31  ;;  %v4447_v31 = vld [vmem:[#allocation2 + $0x46c] ss:$16 sps:$4 sm:$0xff]  }
  0xc5   :  { %1719 = vmatpush1.bf16.msra.mxu0 %v4361_v32  ;;  %v4534_v32 = vld [vmem:[#allocation5 + $0x20] ss:$16 sps:$4 sm:$0xff]  }
  0xc6   :  { %1844 = vmatpush1.bf16.msra.mxu1 %v4364_v33  ;;  %1720 = vmatprep.subr.bf16.mxu0 %v4369_v34  ;;  %v4445_v33 = vld [vmem:[#allocation2 + $0x468] ss:$16 sps:$4 sm:$0xff]   ;;  %v4450_v34 = vld [vmem:[#allocation2 + $0x48c] ss:$16 sps:$4 sm:$0xff]  }
  0xc7   :  { %1845 = vmatprep.subr.bf16.mxu1 %v4372_v35  ;;  %v4540_v35 = vld [vmem:[#allocation5 + $0x40] ss:$16 sps:$4 sm:$0xff]  }
  0xc9   :  { %1721 = vmatpush1.bf16.msra.mxu0 %v4367_v36  ;;  %v4448_v36 = vld [vmem:[#allocation2 + $0x488] ss:$16 sps:$4 sm:$0xff]  }
  0xca   :  { %1846 = vmatpush1.bf16.msra.mxu1 %v4370_v37  ;;  %1722 = vmatprep.subr.bf16.mxu0 %v4375_v38  ;;  %v4453_v37 = vld [vmem:[#allocation2 + $0x4ac] ss:$16 sps:$4 sm:$0xff]   ;;  %v4546_v38 = vld [vmem:[#allocation5 + $0x60] ss:$16 sps:$4 sm:$0xff]  }
  0xcb   :  { %1847 = vmatprep.subr.bf16.mxu1 %v4378_v39  ;;  %v4554_v39 = vld [vmem:[#allocation5 + $0x84] ss:$16 sps:$4 sm:$0xff]  }
  0xcd   :  { %1723 = vmatpush1.bf16.msra.mxu0 %v4373_v40  ;;  %v4451_v40 = vld [vmem:[#allocation2 + $0x4a8] ss:$16 sps:$4 sm:$0xff]  }
  0xce   :  { %1848 = vmatpush1.bf16.msra.mxu1 %v4376_v41  ;;  %1724 = vmatprep.subr.bf16.mxu0 %v4381_v42  ;;  %v4456_v41 = vld [vmem:[#allocation2 + $0x4cc] ss:$16 sps:$4 sm:$0xff]   ;;  %v4552_v42 = vld [vmem:[#allocation5 + $0x80] ss:$16 sps:$4 sm:$0xff]  }
  0xcf   :  { %1849 = vmatprep.subr.bf16.mxu1 %v4384_v43  ;;  %v4560_v43 = vld [vmem:[#allocation5 + $0xa4] ss:$16 sps:$4 sm:$0xff]  }
  0xd1   :  { %1725 = vmatpush1.bf16.msra.mxu0 %v4379_v44  ;;  %v4454_v44 = vld [vmem:[#allocation2 + $0x4c8] ss:$16 sps:$4 sm:$0xff]  }
  0xd2   :  { %1850 = vmatpush1.bf16.msra.mxu1 %v4382_v46  ;;  %1726 = vmatprep.subr.bf16.mxu0 %v4387_v47  ;;  %v4459_v46 = vld [vmem:[#allocation2 + $0x4ec] ss:$16 sps:$4 sm:$0xff]   ;;  %v4558_v47 = vld [vmem:[#allocation5 + $0xa0] ss:$16 sps:$4 sm:$0xff]  }
  0xd3   :  { %1851 = vmatprep.subr.bf16.mxu1 %v4390_v48  ;;  %v4566_v48 = vld [vmem:[#allocation5 + $0xc4] ss:$16 sps:$4 sm:$0xff]  }
  0xd5   :  { %1727 = vmatpush1.bf16.msra.mxu0 %v4385_v49  ;;  %v4457_v49 = vld [vmem:[#allocation2 + $0x4e8] ss:$16 sps:$4 sm:$0xff]  }
  0xd6   :  { %1852 = vmatpush1.bf16.msra.mxu1 %v4388_v50  ;;  %1728 = vmatprep.subr.bf16.mxu0 %v4393_v51  ;;  %v4462_v50 = vld [vmem:[#allocation2 + $0x50c] ss:$16 sps:$4 sm:$0xff]   ;;  %v4564_v51 = vld [vmem:[#allocation5 + $0xc0] ss:$16 sps:$4 sm:$0xff]  }
  0xd7   :  { %1853 = vmatprep.subr.bf16.mxu1 %v4396_v52  ;;  %v4572_v52 = vld [vmem:[#allocation5 + $0xe4] ss:$16 sps:$4 sm:$0xff]  }
  0xd9   :  { %1729 = vmatpush1.bf16.msra.mxu0 %v4391_v53  ;;  %v4460_v53 = vld [vmem:[#allocation2 + $0x508] ss:$16 sps:$4 sm:$0xff]  }
  0xda   :  { %1854 = vmatpush1.bf16.msra.mxu1 %v4394_v54  ;;  %1730 = vmatprep.subr.bf16.mxu0 %v4399_v55  ;;  %v4465_v54 = vld [vmem:[#allocation2 + $0x52c] ss:$16 sps:$4 sm:$0xff]   ;;  %v4570_v55 = vld [vmem:[#allocation5 + $0xe0] ss:$16 sps:$4 sm:$0xff]  }
  0xdb   :  { %1855 = vmatprep.subr.bf16.mxu1 %v4402_v56  ;;  %v4578_v56 = vld [vmem:[#allocation5 + $0x104] ss:$16 sps:$4 sm:$0xff]  }
  0xdd   :  { %1731 = vmatpush1.bf16.msra.mxu0 %v4397_v57  ;;  %v4463_v57 = vld [vmem:[#allocation2 + $0x528] ss:$16 sps:$4 sm:$0xff]  }
  0xde   :  { %1856 = vmatpush1.bf16.msra.mxu1 %v4400_v58  ;;  %1732 = vmatprep.subr.bf16.mxu0 %v4405_v59  ;;  %v4468_v58 = vld [vmem:[#allocation2 + $0x54c] ss:$16 sps:$4 sm:$0xff]   ;;  %v4576_v59 = vld [vmem:[#allocation5 + $0x100] ss:$16 sps:$4 sm:$0xff]  }
  0xdf   :  { %1857 = vmatprep.subr.bf16.mxu1 %v4408_v60  ;;  %v4584_v60 = vld [vmem:[#allocation5 + $0x124] ss:$16 sps:$4 sm:$0xff]  }
  0xe1   :  { %1733 = vmatpush1.bf16.msra.mxu0 %v4403_v61  ;;  %v4466_v61 = vld [vmem:[#allocation2 + $0x548] ss:$16 sps:$4 sm:$0xff]  }
  0xe2   :  { %1858 = vmatpush1.bf16.msra.mxu1 %v4406_v62  ;;  %1734 = vmatprep.subr.bf16.mxu0 %v4411_v63  ;;  %v4471_v62 = vld [vmem:[#allocation2 + $0x56c] ss:$16 sps:$4 sm:$0xff]   ;;  %v4582_v63 = vld [vmem:[#allocation5 + $0x120] ss:$16 sps:$4 sm:$0xff]  }
  0xe3   :  { %1859 = vmatprep.subr.bf16.mxu1 %v4414_v0  ;;  %v4590_v0 = vld [vmem:[#allocation5 + $0x144] ss:$16 sps:$4 sm:$0xff]  }
  0xe5   :  { %1735 = vmatpush1.bf16.msra.mxu0 %v4409_v1  ;;  %v4469_v1 = vld [vmem:[#allocation2 + $0x568] ss:$16 sps:$4 sm:$0xff]  }
  0xe6   :  { %1860 = vmatpush1.bf16.msra.mxu1 %v4412_v2  ;;  %1736 = vmatprep.subr.bf16.mxu0 %v4417_v3  ;;  %v4474_v2 = vld [vmem:[#allocation2 + $0x58c] ss:$16 sps:$4 sm:$0xff]   ;;  %v4588_v3 = vld [vmem:[#allocation5 + $0x140] ss:$16 sps:$4 sm:$0xff]  }
  0xe7   :  { %1861 = vmatprep.subr.bf16.mxu1 %v4420_v4  ;;  %v4596_v4 = vld [vmem:[#allocation5 + $0x164] ss:$16 sps:$4 sm:$0xff]  }
  0xe9   :  { %1737 = vmatpush1.bf16.msra.mxu0 %v4415_v5  ;;  %v4472_v5 = vld [vmem:[#allocation2 + $0x588] ss:$16 sps:$4 sm:$0xff]  }
  0xea   :  { %1862 = vmatpush1.bf16.msra.mxu1 %v4418_v7  ;;  %1738 = vmatprep.subr.bf16.mxu0 %v4423_v8  ;;  %v4594_v7 = vld [vmem:[#allocation5 + $0x160] ss:$16 sps:$4 sm:$0xff]   ;;  %v4477_v8 = vld [vmem:[#allocation2 + $0x5ac] ss:$16 sps:$4 sm:$0xff]  }
  0xeb   :  { %1863 = vmatprep.subr.bf16.mxu1 %v4426_v9  ;;  %v4602_v9 = vld [vmem:[#allocation5 + $0x184] ss:$16 sps:$4 sm:$0xff]  }
  0xed   :  { %1739 = vmatpush1.bf16.msra.mxu0 %v4421_v10  ;;  %v4475_v10 = vld [vmem:[#allocation2 + $0x5a8] ss:$16 sps:$4 sm:$0xff]  }
  0xee   :  { %1864 = vmatpush1.bf16.msra.mxu1 %v4424_v11  ;;  %1740 = vmatprep.subr.bf16.mxu0 %v4429_v13  ;;  %v4600_v11 = vld [vmem:[#allocation5 + $0x180] ss:$16 sps:$4 sm:$0xff]   ;;  %v4480_v13 = vld [vmem:[#allocation2 + $0x5cc] ss:$16 sps:$4 sm:$0xff]  }
  0xef   :  { %1865 = vmatprep.subr.bf16.mxu1 %v4432_v14  ;;  %v4478_v14 = vld [vmem:[#allocation2 + $0x5c8] ss:$16 sps:$4 sm:$0xff]  }
  0xf1   :  { %1741 = vmatpush1.bf16.msra.mxu0 %v4427_v15  ;;  %v4483_v15 = vld [vmem:[#allocation2 + $0x5ec] ss:$16 sps:$4 sm:$0xff]  }
  0xf2   :  { %1866 = vmatpush1.bf16.msra.mxu1 %v4430_v16  ;;  %1742 = vmatprep.subr.bf16.mxu0 %v4435_v17  ;;  %v4481_v16 = vld [vmem:[#allocation2 + $0x5e8] ss:$16 sps:$4 sm:$0xff]   ;;  %v4486_v17 = vld [vmem:[#allocation2 + $0x60c] ss:$16 sps:$4 sm:$0xff]  }
  0xf3   :  { %1876 = vmatprep.subr.bf16.mxu1 %v4438_v18  ;;  %v4484_v18 = vld [vmem:[#allocation2 + $0x608] ss:$16 sps:$4 sm:$0xff]  }
  0xf5   :  { %1868 = vmatmul.mubr.bf16.vlgmr.msra.gmra.mrb[4].mxu1 %v5061_v19  ;;  %1743 = vmatpush1.bf16.msra.mxu0 %v4433_v20  ;;  %v4542_v19 = vld [vmem:[#allocation5 + $0x44] ss:$16 sps:$4 sm:$0xff]   ;;  %v4489_v20 = vld [vmem:[#allocation2 + $0x62c] ss:$16 sps:$4 sm:$0xff]  }
  0xf6   :  { %1877 = vmatpush1.bf16.msra.mxu1 %v4436_v21  ;;  %1908 = vmatprep.mubr.bf16.mxu1 %v5067_v24  ;;  %v4548_v24 = vld [vmem:[#allocation5 + $0x64] ss:$16 sps:$4 sm:$0xff]   ;;  %v4487_v21 = vld [vmem:[#allocation2 + $0x628] ss:$16 sps:$4 sm:$0xff]  }
  0xf7   :  { %1878 = vmatprep.subr.bf16.mxu1 %v4441_v23  ;;  %2760 = vmatprep.subr.bf16.mxu0 %v4530_v12  ;;  %v4490_v23 = vld [vmem:[#allocation2 + $0x648] ss:$16 sps:$4 sm:$0xff]   ;;  %v4495_v12 = vld [vmem:[#allocation2 + $0x66c] ss:$16 sps:$4 sm:$0xff]  }
  0xf8   :  { %1745 = vmatmul.mubr.bf16.vlgmr.msra.gmra.mrb[0].mxu0 %v5075_v25 }
  0xf9   :  { %2761 = vmatpush1.bf16.msra.mxu0 %v4528_v28  ;;  %v4496_v28 = vld [vmem:[#allocation2 + $0x688] ss:$16 sps:$4 sm:$0xff]  }
  0xfa   :  { %1879 = vmatpush1.bf16.msra.mxu1 %v4439_v26  ;;  %2762 = vmatprep.subr.bf16.mxu0 %v4536_v29  ;;  %v4493_v26 = vld [vmem:[#allocation2 + $0x668] ss:$16 sps:$4 sm:$0xff]   ;;  %v4501_v29 = vld [vmem:[#allocation2 + $0x6ac] ss:$16 sps:$4 sm:$0xff]  }
  0xfb   :  { %1880 = vmatprep.subr.bf16.mxu1 %v4444_v27  ;;  %v4498_v27 = vld [vmem:[#allocation2 + $0x68c] ss:$16 sps:$4 sm:$0xff]  }
  0xfd   :  { %2763 = vmatpush1.bf16.msra.mxu0 %v4534_v32 }
  0xfe   :  { %1881 = vmatpush1.bf16.msra.mxu1 %v4442_v30  ;;  %2764 = vmatprep.subr.bf16.mxu0 %v4542_v19  ;;  %v4504_v30 = vld [vmem:[#allocation2 + $0x6cc] ss:$16 sps:$4 sm:$0xff]   ;;  %v4502_v19 = vld [vmem:[#allocation2 + $0x6c8] ss:$16 sps:$4 sm:$0xff]  }
  0xff   :  { %1882 = vmatprep.subr.bf16.mxu1 %v4447_v31 }
 0x101   :  { %2765 = vmatpush1.bf16.msra.mxu0 %v4540_v35  ;;  %v4608_v35 = vld [vmem:[#allocation5 + $0x1a4] ss:$16 sps:$4 sm:$0xff]  }
 0x102   :  { %1883 = vmatpush1.bf16.msra.mxu1 %v4445_v33  ;;  %2766 = vmatprep.subr.bf16.mxu0 %v4548_v24  ;;  %v4606_v24 = vld [vmem:[#allocation5 + $0x1a0] ss:$16 sps:$4 sm:$0xff]  }
 0x103   :  { %1884 = vmatprep.subr.bf16.mxu1 %v4450_v34  ;;  %v4507_v34 = vld [vmem:[#allocation2 + $0x6ec] ss:$16 sps:$4 sm:$0xff]  }
 0x105   :  { %2767 = vmatpush1.bf16.msra.mxu0 %v4546_v38  ;;  %v4614_v38 = vld [vmem:[#allocation5 + $0x1c4] ss:$16 sps:$4 sm:$0xff]  }
 0x106   :  { %1885 = vmatpush1.bf16.msra.mxu1 %v4448_v36  ;;  %2768 = vmatprep.subr.bf16.mxu0 %v4554_v39  ;;  %v4505_v36 = vld [vmem:[#allocation2 + $0x6e8] ss:$16 sps:$4 sm:$0xff]   ;;  %v4612_v39 = vld [vmem:[#allocation5 + $0x1c0] ss:$16 sps:$4 sm:$0xff]  }
 0x107   :  { %1886 = vmatprep.subr.bf16.mxu1 %v4453_v37  ;;  %v4510_v37 = vld [vmem:[#allocation2 + $0x70c] ss:$16 sps:$4 sm:$0xff]  }
 0x109   :  { %2769 = vmatpush1.bf16.msra.mxu0 %v4552_v42  ;;  %v4620_v42 = vld [vmem:[#allocation5 + $0x1e4] ss:$16 sps:$4 sm:$0xff]  }
 0x10a   :  { %1887 = vmatpush1.bf16.msra.mxu1 %v4451_v40  ;;  %2770 = vmatprep.subr.bf16.mxu0 %v4560_v43  ;;  %v4508_v40 = vld [vmem:[#allocation2 + $0x708] ss:$16 sps:$4 sm:$0xff]   ;;  %v4618_v43 = vld [vmem:[#allocation5 + $0x1e0] ss:$16 sps:$4 sm:$0xff]  }
 0x10b   :  { %1888 = vmatprep.subr.bf16.mxu1 %v4456_v41  ;;  %v4513_v41 = vld [vmem:[#allocation2 + $0x72c] ss:$16 sps:$4 sm:$0xff]  }
 0x10d   :  { %2771 = vmatpush1.bf16.msra.mxu0 %v4558_v47  ;;  %v4626_v47 = vld [vmem:[#allocation5 + $0x204] ss:$16 sps:$4 sm:$0xff]  }
 0x10e   :  { %1889 = vmatpush1.bf16.msra.mxu1 %v4454_v44  ;;  %2772 = vmatprep.subr.bf16.mxu0 %v4566_v48  ;;  %v4511_v44 = vld [vmem:[#allocation2 + $0x728] ss:$16 sps:$4 sm:$0xff]  }
 0x10f   :  { %1890 = vmatprep.subr.bf16.mxu1 %v4459_v46  ;;  %v4516_v46 = vld [vmem:[#allocation2 + $0x74c] ss:$16 sps:$4 sm:$0xff]   ;;  %v4514_v48 = vld [vmem:[#allocation2 + $0x748] ss:$16 sps:$4 sm:$0xff]  }
 0x111   :  { %2773 = vmatpush1.bf16.msra.mxu0 %v4564_v51  ;;  %v4522_v51 = vld [vmem:[#allocation2 + $0x78c] ss:$16 sps:$4 sm:$0xff]  }
 0x112   :  { %1891 = vmatpush1.bf16.msra.mxu1 %v4457_v49  ;;  %2774 = vmatprep.subr.bf16.mxu0 %v4572_v52  ;;  %v4519_v49 = vld [vmem:[#allocation2 + $0x76c] ss:$16 sps:$4 sm:$0xff]   ;;  %v4520_v52 = vld [vmem:[#allocation2 + $0x788] ss:$16 sps:$4 sm:$0xff]  }
 0x113   :  { %1892 = vmatprep.subr.bf16.mxu1 %v4462_v50  ;;  %v4517_v50 = vld [vmem:[#allocation2 + $0x768] ss:$16 sps:$4 sm:$0xff]  }
 0x115   :  { %2775 = vmatpush1.bf16.msra.mxu0 %v4570_v55  ;;  %v4523_v55 = vld [vmem:[#allocation2 + $0x7a8] ss:$16 sps:$4 sm:$0xff]  }
 0x116   :  { %1893 = vmatpush1.bf16.msra.mxu1 %v4460_v53  ;;  %2776 = vmatprep.subr.bf16.mxu0 %v4578_v56  ;;  %v4525_v53 = vld [vmem:[#allocation2 + $0x7ac] ss:$16 sps:$4 sm:$0xff]  }
 0x117   :  { %1894 = vmatprep.subr.bf16.mxu1 %v4465_v54  ;;  %v340_v54 = vld [vmem:[#allocation2 + $0x7c8] sm:$0xff] }
 0x118   :  { %v3864_v56 = vcombine.high %v340_v54, %v340_v54 }
 0x119   :  { %2777 = vmatpush1.bf16.msra.mxu0 %v4576_v59  ;;  %v4533_v59 = vld [vmem:[#allocation5 + $0xc] ss:$16 sps:$4 sm:$0xff]  }
 0x11a   :  { %1895 = vmatpush1.bf16.msra.mxu1 %v4463_v57  ;;  %2778 = vmatprep.subr.bf16.mxu0 %v4584_v60  ;;  %v3863_v57 = vcombine.low %v340_v54, %v340_v54  ;;  %v4531_v60 = vld [vmem:[#allocation5 + $0x8] ss:$16 sps:$4 sm:$0xff]   ;;  %v4635_v54 = vld [vmem:[#allocation5 + $0x22c] ss:$16 sps:$4 sm:$0xff]  }
 0x11b   :  { %1896 = vmatprep.subr.bf16.mxu1 %v4468_v58 }
 0x11c   :  { %v1625_v58 = vsel %vm1617_vm1, %v3863_v57, 0  ;;  %v4636_v57 = vld [vmem:[#allocation5 + $0x240] ss:$16 sps:$4 sm:$0xff]  }
 0x11d   :  { %2779 = vmatpush1.bf16.msra.mxu0 %v4582_v63  ;;  %v4545_v63 = vld [vmem:[#allocation5 + $0x4c] ss:$16 sps:$4 sm:$0xff]  }
 0x11e   :  { %1897 = vmatpush1.bf16.msra.mxu1 %v4466_v61  ;;  %2780 = vmatprep.subr.bf16.mxu0 %v4590_v0  ;;  %v4539_v61 = vld [vmem:[#allocation5 + $0x2c] ss:$16 sps:$4 sm:$0xff]   ;;  %v4543_v0 = vld [vmem:[#allocation5 + $0x48] ss:$16 sps:$4 sm:$0xff]  }
 0x11f   :  { %1898 = vmatprep.subr.bf16.mxu1 %v4471_v62  ;;  %v4537_v62 = vld [vmem:[#allocation5 + $0x28] ss:$16 sps:$4 sm:$0xff]  }
 0x121   :  { %2781 = vmatpush1.bf16.msra.mxu0 %v4588_v3  ;;  %v4557_v3 = vld [vmem:[#allocation5 + $0x8c] ss:$16 sps:$4 sm:$0xff]  }
 0x122   :  { %1899 = vmatpush1.bf16.msra.mxu1 %v4469_v1  ;;  %2782 = vmatprep.subr.bf16.mxu0 %v4596_v4  ;;  %v4551_v1 = vld [vmem:[#allocation5 + $0x6c] ss:$16 sps:$4 sm:$0xff]   ;;  %v4555_v4 = vld [vmem:[#allocation5 + $0x88] ss:$16 sps:$4 sm:$0xff]  }
 0x123   :  { %1900 = vmatprep.subr.bf16.mxu1 %v4474_v2  ;;  %v4549_v2 = vld [vmem:[#allocation5 + $0x68] ss:$16 sps:$4 sm:$0xff]  }
 0x125   :  { %2783 = vmatpush1.bf16.msra.mxu0 %v4594_v7  ;;  %v4561_v7 = vld [vmem:[#allocation5 + $0xa8] ss:$16 sps:$4 sm:$0xff]  }
 0x126   :  { %1901 = vmatpush1.bf16.msra.mxu1 %v4472_v5  ;;  %2784 = vmatprep.subr.bf16.mxu0 %v4602_v9  ;;  %v4563_v5 = vld [vmem:[#allocation5 + $0xac] ss:$16 sps:$4 sm:$0xff]  }
 0x127   :  { %1902 = vmatprep.subr.bf16.mxu1 %v4477_v8  ;;  %v4567_v8 = vld [vmem:[#allocation5 + $0xc8] ss:$16 sps:$4 sm:$0xff]   ;;  %v4575_v9 = vld [vmem:[#allocation5 + $0xec] ss:$16 sps:$4 sm:$0xff]  }
 0x129   :  { %2785 = vmatpush1.bf16.msra.mxu0 %v4600_v11  ;;  %v4581_v11 = vld [vmem:[#allocation5 + $0x10c] ss:$16 sps:$4 sm:$0xff]  }
 0x12a   :  { %1903 = vmatpush1.bf16.msra.mxu1 %v4475_v10  ;;  %2786 = vmatprep.subr.bf16.mxu0 %v4608_v35  ;;  %v4573_v10 = vld [vmem:[#allocation5 + $0xe8] ss:$16 sps:$4 sm:$0xff]  }
 0x12b   :  { %1904 = vmatprep.subr.bf16.mxu1 %v4480_v13  ;;  %v4579_v13 = vld [vmem:[#allocation5 + $0x108] ss:$16 sps:$4 sm:$0xff]  }
 0x12d   :  { %2787 = vmatpush1.bf16.msra.mxu0 %v4606_v24 }
 0x12e   :  { %1905 = vmatpush1.bf16.msra.mxu1 %v4478_v14  ;;  %2788 = vmatprep.subr.bf16.mxu0 %v4614_v38  ;;  %v4587_v14 = vld [vmem:[#allocation5 + $0x12c] ss:$16 sps:$4 sm:$0xff]  }
 0x12f   :  { %1906 = vmatprep.subr.bf16.mxu1 %v4483_v15  ;;  %v4585_v15 = vld [vmem:[#allocation5 + $0x128] ss:$16 sps:$4 sm:$0xff]  }
 0x131   :  { %2789 = vmatpush1.bf16.msra.mxu0 %v4612_v39 }
 0x132   :  { %1907 = vmatpush1.bf16.msra.mxu1 %v4481_v16  ;;  %2790 = vmatprep.subr.bf16.mxu0 %v4620_v42  ;;  %v4593_v16 = vld [vmem:[#allocation5 + $0x14c] ss:$16 sps:$4 sm:$0xff]  }
 0x133   :  { %1917 = vmatprep.subr.bf16.mxu1 %v4486_v17  ;;  %v4591_v17 = vld [vmem:[#allocation5 + $0x148] ss:$16 sps:$4 sm:$0xff]  }
 0x135   :  { %1909 = vmatmul.mubr.bf16.vlgmr.msra.gmra.mrb[4].mxu1 %v5075_v25  ;;  %v4499_v25 = vld [vmem:[#allocation2 + $0x6a8] ss:$16 sps:$4 sm:$0xff]   ;;  %2791 = vmatpush1.bf16.msra.mxu0 %v4618_v43 }
 0x136   :  { %1918 = vmatpush1.bf16.msra.mxu1 %v4484_v18  ;;  %3868 = vmatprep.mubr.msk.bf16.mxu1 %vm1613_vm0, %v5030_v45  ;;  %v4599_v18 = vld [vmem:[#allocation5 + $0x16c] ss:$16 sps:$4 sm:$0xff]  }
 0x137   :  { %1919 = vmatprep.subr.bf16.mxu1 %v4489_v20  ;;  %2801 = vmatprep.subr.bf16.mxu0 %v4626_v47  ;;  %v4597_v20 = vld [vmem:[#allocation5 + $0x168] ss:$16 sps:$4 sm:$0xff]  }
 0x13a   :  { %1920 = vmatpush1.bf16.msra.mxu1 %v4487_v21  ;;  %v4605_v21 = vld [vmem:[#allocation5 + $0x18c] ss:$16 sps:$4 sm:$0xff]  }
 0x13b   :  { %1921 = vmatprep.subr.bf16.mxu1 %v4492_v22  ;;  %v4603_v22 = vld [vmem:[#allocation5 + $0x188] ss:$16 sps:$4 sm:$0xff]  }
 0x13e   :  { %1922 = vmatpush1.bf16.msra.mxu1 %v4490_v23  ;;  %v4611_v23 = vld [vmem:[#allocation5 + $0x1ac] ss:$16 sps:$4 sm:$0xff]  }
 0x13f   :  { %1923 = vmatprep.subr.bf16.mxu1 %v4495_v12  ;;  %v4609_v12 = vld [vmem:[#allocation5 + $0x1a8] ss:$16 sps:$4 sm:$0xff]  }
 0x142   :  { %1924 = vmatpush1.bf16.msra.mxu1 %v4493_v26  ;;  %v4617_v26 = vld [vmem:[#allocation5 + $0x1cc] ss:$16 sps:$4 sm:$0xff]  }
 0x143   :  { %1925 = vmatprep.subr.bf16.mxu1 %v4498_v27  ;;  %v4615_v27 = vld [vmem:[#allocation5 + $0x1c8] ss:$16 sps:$4 sm:$0xff]  }
 0x146   :  { %1926 = vmatpush1.bf16.msra.mxu1 %v4496_v28  ;;  %v4623_v28 = vld [vmem:[#allocation5 + $0x1ec] ss:$16 sps:$4 sm:$0xff]  }
 0x147   :  { %1927 = vmatprep.subr.bf16.mxu1 %v4501_v29  ;;  %v4621_v29 = vld [vmem:[#allocation5 + $0x1e8] ss:$16 sps:$4 sm:$0xff]  }
 0x148   :  { %v5082_v31 = vpop.f32.mrb[0].mxu1 }
 0x149   :  { %v5084_v45 = vpop.f32.mrb[1].mxu1 }
 0x14a   :  { %v1791_v32 = vpop.f32.mrb[2].mxu1  ;;  %1928 = vmatpush1.bf16.msra.mxu1 %v4499_v25  ;;  %v4629_v25 = vld [vmem:[#allocation5 + $0x20c] ss:$16 sps:$4 sm:$0xff]  }
 0x14b   :  { %v1792_v33 = vpop.f32.mrb[3].mxu1  ;;  %1929 = vmatprep.subr.bf16.mxu1 %v4504_v30  ;;  %v343_v30 = vlaneseq }
 0x14c   :  { %v5097_v33 = vld [vmem:[%s5204_s2] sm:$0xf] }
 0x14d   :  { %v5089_v32 = vshrl.u32 %v343_v30, 7  ;;  %v4695_v30 = vld [vmem:[#allocation5 + $0x36c] ss:$16 sps:$4 sm:$0xff]  }
 0x14e   :  { %1930 = vmatpush1.bf16.msra.mxu1 %v4502_v19 }
 0x14f   :  { %1931 = vmatprep.subr.bf16.mxu1 %v4507_v34  ;;  %v5092_v19 = vsub.s32 0, %v5089_v32  ;;  %v5100_v34 = vsub.s32 1, %v5089_v32 }
 0x151   :  { %v346_v35 = vrot.slane %v5097_v33, %v5092_v19  ;;  %v350_v24 = vrot.slane %v5097_v33, %v5100_v34 }
 0x152   :  { %1932 = vmatpush1.bf16.msra.mxu1 %v4505_v36 }
 0x153   :  { %1933 = vmatprep.subr.bf16.mxu1 %v4510_v37 }
 0x156   :  { %1934 = vmatpush1.bf16.msra.mxu1 %v4508_v40 }
 0x157   :  { %1935 = vmatprep.subr.bf16.mxu1 %v4513_v41 }
 0x15a   :  { %1936 = vmatpush1.bf16.msra.mxu1 %v4511_v44 }
 0x15b   :  { %1937 = vmatprep.subr.bf16.mxu1 %v4516_v46 }
 0x15e   :  { %1938 = vmatpush1.bf16.msra.mxu1 %v4514_v48 }
 0x15f   :  { %1939 = vmatprep.subr.bf16.mxu1 %v4519_v49 }
 0x162   :  { %1940 = vmatpush1.bf16.msra.mxu1 %v4517_v50  ;;  %v4624_v50 = vld [vmem:[#allocation5 + $0x200] ss:$16 sps:$4 sm:$0xff]  }
 0x163   :  { %1941 = vmatprep.subr.bf16.mxu1 %v4522_v51  ;;  %v4627_v51 = vld [vmem:[#allocation5 + $0x208] ss:$16 sps:$4 sm:$0xff]  }
 0x166   :  { %1942 = vmatpush1.bf16.msra.mxu1 %v4520_v52 }
 0x167   :  { %1943 = vmatprep.subr.bf16.mxu1 %v4525_v53  ;;  %v4632_v53 = vld [vmem:[#allocation5 + $0x224] ss:$16 sps:$4 sm:$0xff]  }
 0x16a   :  { %1944 = vmatpush1.bf16.msra.mxu1 %v4523_v55  ;;  %v4633_v55 = vld [vmem:[#allocation5 + $0x228] ss:$16 sps:$4 sm:$0xff]  }
 0x16b   :  { %3867 = vmatprep.subr.msk.bf16.mxu1 %vm1617_vm1, %v3864_v56  ;;  %v4641_v56 = vld [vmem:[#allocation5 + $0x24c] ss:$16 sps:$4 sm:$0xff]  }
 0x16e   :  { %1946 = vmatpush1.bf16.msra.mxu1 %v1625_v58  ;;  %v4639_v58 = vld [vmem:[#allocation5 + $0x248] ss:$16 sps:$4 sm:$0xff]  }
 0x16f   :  { %2842 = vmatprep.subr.bf16.mxu1 %v4533_v59  ;;  %v4644_v59 = vld [vmem:[#allocation5 + $0x264] ss:$16 sps:$4 sm:$0xff]  }
 0x171   :  { %1950 = vmatmul.mubr.bf16.vlgmr.msra.gmra.mrb[4].mxu1 %v5042_v6  ;;  %v4569_v6 = vld [vmem:[#allocation5 + $0xcc] ss:$16 sps:$4 sm:$0xff]  }
 0x172   :  { %2843 = vmatpush1.bf16.msra.mxu1 %v4531_v60  ;;  %v4647_v60 = vld [vmem:[#allocation5 + $0x26c] ss:$16 sps:$4 sm:$0xff]  }
 0x173   :  { %2844 = vmatprep.subr.bf16.mxu1 %v4539_v61  ;;  %v4642_v61 = vld [vmem:[#allocation5 + $0x260] ss:$16 sps:$4 sm:$0xff]  }
 0x176   :  { %2845 = vmatpush1.bf16.msra.mxu1 %v4537_v62  ;;  %v4645_v62 = vld [vmem:[#allocation5 + $0x268] ss:$16 sps:$4 sm:$0xff]  }
 0x177   :  { %2846 = vmatprep.subr.bf16.mxu1 %v4545_v63  ;;  %v4650_v63 = vld [vmem:[#allocation5 + $0x284] ss:$16 sps:$4 sm:$0xff]  }
 0x17a   :  { %2847 = vmatpush1.bf16.msra.mxu1 %v4543_v0  ;;  %v4653_v0 = vld [vmem:[#allocation5 + $0x28c] ss:$16 sps:$4 sm:$0xff]  }
 0x17b   :  { %2848 = vmatprep.subr.bf16.mxu1 %v4551_v1  ;;  %v4648_v1 = vld [vmem:[#allocation5 + $0x280] ss:$16 sps:$4 sm:$0xff]  }
 0x17e   :  { %2849 = vmatpush1.bf16.msra.mxu1 %v4549_v2  ;;  %v4651_v2 = vld [vmem:[#allocation5 + $0x288] ss:$16 sps:$4 sm:$0xff]  }
 0x17f   :  { %2850 = vmatprep.subr.bf16.mxu1 %v4557_v3  ;;  %v4656_v3 = vld [vmem:[#allocation5 + $0x2a4] ss:$16 sps:$4 sm:$0xff]  }
 0x182   :  { %2851 = vmatpush1.bf16.msra.mxu1 %v4555_v4  ;;  %v4659_v4 = vld [vmem:[#allocation5 + $0x2ac] ss:$16 sps:$4 sm:$0xff]  }
 0x183   :  { %2852 = vmatprep.subr.bf16.mxu1 %v4563_v5  ;;  %v4654_v5 = vld [vmem:[#allocation5 + $0x2a0] ss:$16 sps:$4 sm:$0xff]  }
 0x186   :  { %2853 = vmatpush1.bf16.msra.mxu1 %v4561_v7  ;;  %v4657_v7 = vld [vmem:[#allocation5 + $0x2a8] ss:$16 sps:$4 sm:$0xff]  }
 0x187   :  { %2854 = vmatprep.subr.bf16.mxu1 %v4569_v6  ;;  %v4662_v6 = vld [vmem:[#allocation5 + $0x2c4] ss:$16 sps:$4 sm:$0xff]  }
 0x18a   :  { %2855 = vmatpush1.bf16.msra.mxu1 %v4567_v8  ;;  %v4665_v8 = vld [vmem:[#allocation5 + $0x2cc] ss:$16 sps:$4 sm:$0xff]  }
 0x18b   :  { %2856 = vmatprep.subr.bf16.mxu1 %v4575_v9  ;;  %v4660_v9 = vld [vmem:[#allocation5 + $0x2c0] ss:$16 sps:$4 sm:$0xff]  }
 0x18e   :  { %2857 = vmatpush1.bf16.msra.mxu1 %v4573_v10  ;;  %v4663_v10 = vld [vmem:[#allocation5 + $0x2c8] ss:$16 sps:$4 sm:$0xff]  }
 0x18f   :  { %2858 = vmatprep.subr.bf16.mxu1 %v4581_v11  ;;  %v4668_v11 = vld [vmem:[#allocation5 + $0x2e4] ss:$16 sps:$4 sm:$0xff]  }
 0x192   :  { %2859 = vmatpush1.bf16.msra.mxu1 %v4579_v13  ;;  %v4671_v13 = vld [vmem:[#allocation5 + $0x2ec] ss:$16 sps:$4 sm:$0xff]  }
 0x193   :  { %2860 = vmatprep.subr.bf16.mxu1 %v4587_v14  ;;  %v4666_v14 = vld [vmem:[#allocation5 + $0x2e0] ss:$16 sps:$4 sm:$0xff]  }
 0x196   :  { %2861 = vmatpush1.bf16.msra.mxu1 %v4585_v15  ;;  %v4669_v15 = vld [vmem:[#allocation5 + $0x2e8] ss:$16 sps:$4 sm:$0xff]  }
 0x197   :  { %2862 = vmatprep.subr.bf16.mxu1 %v4593_v16  ;;  %v4674_v16 = vld [vmem:[#allocation5 + $0x304] ss:$16 sps:$4 sm:$0xff]  }
 0x19a   :  { %2863 = vmatpush1.bf16.msra.mxu1 %v4591_v17  ;;  %v4677_v17 = vld [vmem:[#allocation5 + $0x30c] ss:$16 sps:$4 sm:$0xff]  }
 0x19b   :  { %2864 = vmatprep.subr.bf16.mxu1 %v4599_v18  ;;  %v4672_v18 = vld [vmem:[#allocation5 + $0x300] ss:$16 sps:$4 sm:$0xff]  }
 0x19e   :  { %2865 = vmatpush1.bf16.msra.mxu1 %v4597_v20  ;;  %v4675_v20 = vld [vmem:[#allocation5 + $0x308] ss:$16 sps:$4 sm:$0xff]  }
 0x19f   :  { %2866 = vmatprep.subr.bf16.mxu1 %v4605_v21  ;;  %v4680_v21 = vld [vmem:[#allocation5 + $0x324] ss:$16 sps:$4 sm:$0xff]  }
 0x1a2   :  { %2867 = vmatpush1.bf16.msra.mxu1 %v4603_v22  ;;  %v4683_v22 = vld [vmem:[#allocation5 + $0x32c] ss:$16 sps:$4 sm:$0xff]  }
 0x1a3   :  { %2868 = vmatprep.subr.bf16.mxu1 %v4611_v23  ;;  %v4678_v23 = vld [vmem:[#allocation5 + $0x320] ss:$16 sps:$4 sm:$0xff]  }
 0x1a6   :  { %2869 = vmatpush1.bf16.msra.mxu1 %v4609_v12  ;;  %v4681_v12 = vld [vmem:[#allocation5 + $0x328] ss:$16 sps:$4 sm:$0xff]  }
 0x1a7   :  { %2870 = vmatprep.subr.bf16.mxu1 %v4617_v26  ;;  %v4686_v26 = vld [vmem:[#allocation5 + $0x344] ss:$16 sps:$4 sm:$0xff]  }
 0x1aa   :  { %2871 = vmatpush1.bf16.msra.mxu1 %v4615_v27  ;;  %v4689_v27 = vld [vmem:[#allocation5 + $0x34c] ss:$16 sps:$4 sm:$0xff]  }
 0x1ab   :  { %2872 = vmatprep.subr.bf16.mxu1 %v4623_v28  ;;  %v4684_v28 = vld [vmem:[#allocation5 + $0x340] ss:$16 sps:$4 sm:$0xff]  }
 0x1ae   :  { %2873 = vmatpush1.bf16.msra.mxu1 %v4621_v29  ;;  %v4687_v29 = vld [vmem:[#allocation5 + $0x348] ss:$16 sps:$4 sm:$0xff]  }
 0x1af   :  { %2883 = vmatprep.subr.bf16.mxu1 %v4629_v25  ;;  %v4692_v25 = vld [vmem:[#allocation5 + $0x364] ss:$16 sps:$4 sm:$0xff]  }
 0x1cb   :  { %v1746_v36 = vpop.f32.mrb[0].mxu0 }
 0x1cc   :  { %v4100_v37 = vadd.f32 %v1746_v36, %v346_v35  ;;  %v1748_v38 = vpop.f32.mrb[1].mxu0  ;;  %v4690_v35 = vld [vmem:[#allocation5 + $0x360] ss:$16 sps:$4 sm:$0xff]   ;;  %v4698_v36 = vld [vmem:[#allocation5 + $0x384] ss:$16 sps:$4 sm:$0xff]  }
 0x1cd   :  { %v4102_v39 = vadd.f32 %v1748_v38, %v350_v24  ;;  %v1750_v40 = vpop.f32.mrb[2].mxu0  ;;  %v4693_v24 = vld [vmem:[#allocation5 + $0x368] ss:$16 sps:$4 sm:$0xff]   ;;  %v4696_v38 = vld [vmem:[#allocation5 + $0x380] ss:$16 sps:$4 sm:$0xff]  }
 0x1ce   :  { %v4101_v41 = vadd.f32 %v4100_v37, %v5082_v31  ;;  %v1751_v42 = vpop.f32.mrb[3].mxu0  ;;  %v4630_v31 = vld [vmem:[#allocation5 + $0x220] ss:$16 sps:$4 sm:$0xff]   ;;  %v4701_v37 = vld [vmem:[#allocation5 + $0x38c] ss:$16 sps:$4 sm:$0xff]  }
 0x1cf   :  { %v4103_v43 = vadd.f32 %v4102_v39, %v5084_v45  ;;  %v4638_v45 = vld [vmem:[#allocation5 + $0x244] ss:$16 sps:$4 sm:$0xff]   ;;  %v4699_v39 = vld [vmem:[#allocation5 + $0x388] ss:$16 sps:$4 sm:$0xff]   ;;  %v4702_v42 = vld [vmem:[#allocation5 + $0x3a0] ss:$16 sps:$4 sm:$0xff]  }
 0x1d0   :  { %v1958_v44 = vmul.f32 0.01, %v4101_v41  ;;  %v4704_v40 = vld [vmem:[#allocation5 + $0x3a4] ss:$16 sps:$4 sm:$0xff]  }
 0x1d1   :  { %v1959_v46 = vmul.f32 0.01, %v4103_v43 }
 0x1d2   :  { %v1962_v47 = vmax.f32 %v4101_v41, %v1958_v44  ;;  %v4707_v41 = vld [vmem:[#allocation5 + $0x3ac] ss:$16 sps:$4 sm:$0xff]   ;;  %v4710_v44 = vld [vmem:[#allocation5 + $0x3c4] ss:$16 sps:$4 sm:$0xff]  }
 0x1d3   :  { %v1963_v48 = vmax.f32 %v4103_v43, %v1959_v46  ;;  %v4705_v43 = vld [vmem:[#allocation5 + $0x3a8] ss:$16 sps:$4 sm:$0xff]   ;;  %v4713_v46 = vld [vmem:[#allocation5 + $0x3cc] ss:$16 sps:$4 sm:$0xff]  }
 0x1d4   :  { %v1966_v52 = vpack.c.bf16 %v1962_v47, %v1962_v47  ;;  %v4708_v47 = vld [vmem:[#allocation5 + $0x3c0] ss:$16 sps:$4 sm:$0xff]  }
 0x1d5   :  { %v1967_v49 = vpack.c.bf16 %v1963_v48, %v1963_v48  ;;  %v4711_v48 = vld [vmem:[#allocation5 + $0x3c8] ss:$16 sps:$4 sm:$0xff]  }
 0x1d7   :  { %2792 = vmatprep.mubr.bf16.mxu0 %v1967_v49  ;;  %2874 = vmatprep.mubr.bf16.mxu1 %v1967_v49  ;;  %v4716_v49 = vld [vmem:[#allocation5 + $0x3e4] ss:$16 sps:$4 sm:$0xff]  }
 0x1d8   :  { %2793 = vmatmul.mubr.bf16.vlgmr.msra.gmra.mrb[4].mxu0 %v1966_v52  ;;  %2875 = vmatmul.mubr.bf16.vlgmr.msra.gmra.mrb[8].mxu1 %v1966_v52  ;;  %v4717_v52 = vld [vmem:[#allocation5 + $0x3e8] ss:$16 sps:$4 sm:$0xff]  }
 0x1d9   :  { %2802 = vmatpush1.bf16.msra.mxu0 %v4624_v50  ;;  %2884 = vmatpush1.bf16.msra.mxu1 %v4627_v51  ;;  %v4719_v50 = vld [vmem:[#allocation5 + $0x3ec] ss:$16 sps:$4 sm:$0xff]   ;;  %v4714_v51 = vld [vmem:[#allocation5 + $0x3e0] ss:$16 sps:$4 sm:$0xff]  }
 0x1da   :  { %2803 = vmatprep.subr.bf16.mxu0 %v4632_v53  ;;  %2885 = vmatprep.subr.bf16.mxu1 %v4635_v54  ;;  %v4722_v53 = vld [vmem:[#allocation7 + $0x4] ss:$8 sps:$4 sm:$0xff]   ;;  %v353_v54 = vsub.s32 2, %v5089_v32 }
 0x1dd   :  { %2804 = vmatpush1.bf16.msra.mxu0 %v4630_v31  ;;  %2886 = vmatpush1.bf16.msra.mxu1 %v4633_v55  ;;  %v357_v31 = vsub.s32 3, %v5089_v32  ;;  %v354_v55 = vrot.slane %v5097_v33, %v353_v54 }
 0x1de   :  { %2805 = vmatprep.subr.bf16.mxu0 %v4638_v45  ;;  %2887 = vmatprep.subr.bf16.mxu1 %v4641_v56 }
 0x1df   :  { %v358_v45 = vrot.slane %v5097_v33, %v357_v31  ;;  %v4723_v33 = vld [vmem:[#allocation7 + $0x10] ss:$8 sps:$4 sm:$0xff]  }
 0x1e1   :  { %2806 = vmatpush1.bf16.msra.mxu0 %v4636_v57  ;;  %2888 = vmatpush1.bf16.msra.mxu1 %v4639_v58 }
 0x1e2   :  { %2807 = vmatprep.subr.bf16.mxu0 %v4644_v59  ;;  %2889 = vmatprep.subr.bf16.mxu1 %v4647_v60 }
 0x1e5   :  { %2808 = vmatpush1.bf16.msra.mxu0 %v4642_v61  ;;  %2890 = vmatpush1.bf16.msra.mxu1 %v4645_v62 }
 0x1e6   :  { %2809 = vmatprep.subr.bf16.mxu0 %v4650_v63  ;;  %2891 = vmatprep.subr.bf16.mxu1 %v4653_v0 }
 0x1e9   :  { %2810 = vmatpush1.bf16.msra.mxu0 %v4648_v1  ;;  %2892 = vmatpush1.bf16.msra.mxu1 %v4651_v2 }
 0x1ea   :  { %2811 = vmatprep.subr.bf16.mxu0 %v4656_v3  ;;  %2893 = vmatprep.subr.bf16.mxu1 %v4659_v4  ;;  %v4720_v3 = vld [vmem:[#allocation7] ss:$8 sps:$4 sm:$0xff]  }
 0x1ed   :  { %2812 = vmatpush1.bf16.msra.mxu0 %v4654_v5  ;;  %2894 = vmatpush1.bf16.msra.mxu1 %v4657_v7  ;;  %v4725_v5 = vld [vmem:[#allocation7 + $0x14] ss:$8 sps:$4 sm:$0xff]   ;;  %v4728_v7 = vld [vmem:[#allocation7 + $0x24] ss:$8 sps:$4 sm:$0xff]  }
 0x1ee   :  { %2813 = vmatprep.subr.bf16.mxu0 %v4662_v6  ;;  %2895 = vmatprep.subr.bf16.mxu1 %v4665_v8  ;;  %v4726_v6 = vld [vmem:[#allocation7 + $0x20] ss:$8 sps:$4 sm:$0xff]   ;;  %v4731_v8 = vld [vmem:[#allocation7 + $0x34] ss:$8 sps:$4 sm:$0xff]  }
 0x1f1   :  { %2814 = vmatpush1.bf16.msra.mxu0 %v4660_v9  ;;  %2896 = vmatpush1.bf16.msra.mxu1 %v4663_v10  ;;  %v4729_v9 = vld [vmem:[#allocation7 + $0x30] ss:$8 sps:$4 sm:$0xff]   ;;  %v4734_v10 = vld [vmem:[#allocation7 + $0x44] ss:$8 sps:$4 sm:$0xff]  }
 0x1f2   :  { %2815 = vmatprep.subr.bf16.mxu0 %v4668_v11  ;;  %2897 = vmatprep.subr.bf16.mxu1 %v4671_v13  ;;  %v4732_v11 = vld [vmem:[#allocation7 + $0x40] ss:$8 sps:$4 sm:$0xff]   ;;  %v4737_v13 = vld [vmem:[#allocation7 + $0x54] ss:$8 sps:$4 sm:$0xff]  }
 0x1f5   :  { %2816 = vmatpush1.bf16.msra.mxu0 %v4666_v14  ;;  %2898 = vmatpush1.bf16.msra.mxu1 %v4669_v15  ;;  %v4735_v14 = vld [vmem:[#allocation7 + $0x50] ss:$8 sps:$4 sm:$0xff]   ;;  %v4740_v15 = vld [vmem:[#allocation7 + $0x64] ss:$8 sps:$4 sm:$0xff]  }
 0x1f6   :  { %2817 = vmatprep.subr.bf16.mxu0 %v4674_v16  ;;  %2899 = vmatprep.subr.bf16.mxu1 %v4677_v17  ;;  %v4738_v16 = vld [vmem:[#allocation7 + $0x60] ss:$8 sps:$4 sm:$0xff]   ;;  %v4743_v17 = vld [vmem:[#allocation7 + $0x74] ss:$8 sps:$4 sm:$0xff]  }
 0x1f9   :  { %2818 = vmatpush1.bf16.msra.mxu0 %v4672_v18  ;;  %2900 = vmatpush1.bf16.msra.mxu1 %v4675_v20  ;;  %v4741_v18 = vld [vmem:[#allocation7 + $0x70] ss:$8 sps:$4 sm:$0xff]   ;;  %v4746_v20 = vld [vmem:[#allocation7 + $0x84] ss:$8 sps:$4 sm:$0xff]  }
 0x1fa   :  { %2819 = vmatprep.subr.bf16.mxu0 %v4680_v21  ;;  %2901 = vmatprep.subr.bf16.mxu1 %v4683_v22  ;;  %v4744_v21 = vld [vmem:[#allocation7 + $0x80] ss:$8 sps:$4 sm:$0xff]   ;;  %v4749_v22 = vld [vmem:[#allocation7 + $0x94] ss:$8 sps:$4 sm:$0xff]  }
 0x1fd   :  { %2820 = vmatpush1.bf16.msra.mxu0 %v4678_v23  ;;  %2902 = vmatpush1.bf16.msra.mxu1 %v4681_v12  ;;  %v4747_v23 = vld [vmem:[#allocation7 + $0x90] ss:$8 sps:$4 sm:$0xff]   ;;  %v4752_v12 = vld [vmem:[#allocation7 + $0xa4] ss:$8 sps:$4 sm:$0xff]  }
 0x1fe   :  { %2821 = vmatprep.subr.bf16.mxu0 %v4686_v26  ;;  %2903 = vmatprep.subr.bf16.mxu1 %v4689_v27  ;;  %v4750_v26 = vld [vmem:[#allocation7 + $0xa0] ss:$8 sps:$4 sm:$0xff]   ;;  %v4755_v27 = vld [vmem:[#allocation7 + $0xb4] ss:$8 sps:$4 sm:$0xff]  }
 0x201   :  { %2822 = vmatpush1.bf16.msra.mxu0 %v4684_v28  ;;  %2904 = vmatpush1.bf16.msra.mxu1 %v4687_v29  ;;  %v4753_v28 = vld [vmem:[#allocation7 + $0xb0] ss:$8 sps:$4 sm:$0xff]   ;;  %v4758_v29 = vld [vmem:[#allocation7 + $0xc4] ss:$8 sps:$4 sm:$0xff]  }
 0x202   :  { %2823 = vmatprep.subr.bf16.mxu0 %v4692_v25  ;;  %2905 = vmatprep.subr.bf16.mxu1 %v4695_v30  ;;  %v4756_v25 = vld [vmem:[#allocation7 + $0xc0] ss:$8 sps:$4 sm:$0xff]   ;;  %v4761_v30 = vld [vmem:[#allocation7 + $0xd4] ss:$8 sps:$4 sm:$0xff]  }
 0x205   :  { %2824 = vmatpush1.bf16.msra.mxu0 %v4690_v35  ;;  %2906 = vmatpush1.bf16.msra.mxu1 %v4693_v24  ;;  %v4759_v35 = vld [vmem:[#allocation7 + $0xd0] ss:$8 sps:$4 sm:$0xff]   ;;  %v4764_v24 = vld [vmem:[#allocation7 + $0xe4] ss:$8 sps:$4 sm:$0xff]  }
 0x206   :  { %2825 = vmatprep.subr.bf16.mxu0 %v4698_v36  ;;  %2907 = vmatprep.subr.bf16.mxu1 %v4701_v37  ;;  %v4762_v36 = vld [vmem:[#allocation7 + $0xe0] ss:$8 sps:$4 sm:$0xff]   ;;  %v4767_v37 = vld [vmem:[#allocation7 + $0xf4] ss:$8 sps:$4 sm:$0xff]  }
 0x209   :  { %2826 = vmatpush1.bf16.msra.mxu0 %v4696_v38  ;;  %2908 = vmatpush1.bf16.msra.mxu1 %v4699_v39  ;;  %v4765_v38 = vld [vmem:[#allocation7 + $0xf0] ss:$8 sps:$4 sm:$0xff]   ;;  %v4770_v39 = vld [vmem:[#allocation7 + $0x104] ss:$8 sps:$4 sm:$0xff]  }
 0x20a   :  { %2827 = vmatprep.subr.bf16.mxu0 %v4704_v40  ;;  %2909 = vmatprep.subr.bf16.mxu1 %v4707_v41  ;;  %v4816_v40 = vld [vmem:[%s5209_s7 + $0x40] sm:$0xff]  }
 0x20b   :  { %v4817_v41 = vld [vmem:[%s5209_s7] sm:$0xff]  }
 0x20d   :  { %2828 = vmatpush1.bf16.msra.mxu0 %v4702_v42  ;;  %2910 = vmatpush1.bf16.msra.mxu1 %v4705_v43  ;;  %v4818_v42 = vld [vmem:[%s5209_s7 + $0x48] sm:$0xff]  }
 0x20e   :  { %2829 = vmatprep.subr.bf16.mxu0 %v4710_v44  ;;  %2911 = vmatprep.subr.bf16.mxu1 %v4713_v46  ;;  %v4819_v43 = vld [vmem:[%s5209_s7 + $0x8] sm:$0xff]   ;;  %v4820_v44 = vld [vmem:[%s5209_s7 + $0x50] sm:$0xff]  }
 0x20f   :  { %v4821_v46 = vld [vmem:[%s5209_s7 + $0x10] sm:$0xff]  }
 0x211   :  { %2830 = vmatpush1.bf16.msra.mxu0 %v4708_v47  ;;  %2912 = vmatpush1.bf16.msra.mxu1 %v4711_v48  ;;  %v4822_v47 = vld [vmem:[%s5209_s7 + $0x58] sm:$0xff]  }
 0x212   :  { %2831 = vmatprep.subr.bf16.mxu0 %v4716_v49  ;;  %2913 = vmatprep.subr.bf16.mxu1 %v4719_v50  ;;  %v4823_v48 = vld [vmem:[%s5209_s7 + $0x18] sm:$0xff]   ;;  %v4824_v49 = vld [vmem:[%s5209_s7 + $0x60] sm:$0xff]  }
 0x213   :  { %v4825_v50 = vld [vmem:[%s5209_s7 + $0x20] sm:$0xff]  }
 0x215   :  { %2832 = vmatpush1.bf16.msra.mxu0 %v4714_v51  ;;  %2914 = vmatpush1.bf16.msra.mxu1 %v4717_v52  ;;  %v4826_v51 = vld [vmem:[%s5209_s7 + $0x68] sm:$0xff]   ;;  %v5152_v52 = vld [vmem:[%s5206_s4] sm:$0xf] }
 0x216   :  { %3332 = vmatprep.subr.bf16.mxu0 %v4722_v53  ;;  %4078 = vmatprep.subr.bf16.mxu1 %v4816_v40  ;;  %v2103_v53 = vrot.slane %v5152_v52, %v5092_v19  ;;  %v2111_v40 = vrot.slane %v5152_v52, %v353_v54  ;;  %v4827_v54 = vld [vmem:[%s5209_s7 + $0x28] sm:$0xff]  }
 0x244   :  { %v1951_v56 = vpop.f32.mrb[4].mxu1 }
 0x245   :  { %v4104_v57 = vadd.f32 %v1951_v56, %v354_v55  ;;  %v1953_v58 = vpop.f32.mrb[5].mxu1  ;;  %v2107_v55 = vrot.slane %v5152_v52, %v5100_v34 }
 0x246   :  { %v4105_v59 = vadd.f32 %v1953_v58, %v358_v45  ;;  %v1955_v60 = vpop.f32.mrb[6].mxu1  ;;  %v2115_v45 = vrot.slane %v5152_v52, %v357_v31  ;;  %v4768_v31 = vld [vmem:[#allocation7 + $0x100] ss:$8 sps:$4 sm:$0xff]  }
 0x247   :  { %v1960_v61 = vmul.f32 0.01, %v4104_v57  ;;  %v1956_v62 = vpop.f32.mrb[7].mxu1  ;;  %v4829_v52 = vld [vmem:[%s5209_s7 + $0x30] sm:$0xff]  }
 0x248   :  { %v1961_v63 = vmul.f32 0.01, %v4105_v59 }
 0x249   :  { %v1964_v0 = vmax.f32 %v4104_v57, %v1960_v61 }
 0x24a   :  { %v1965_v1 = vmax.f32 %v4105_v59, %v1961_v63 }
 0x24b   :  { %v1968_v4 = vpack.c.bf16 %v1964_v0, %v1964_v0 }
 0x24c   :  { %v1969_v2 = vpack.c.bf16 %v1965_v1, %v1965_v1 }
 0x24e   :  { %2833 = vmatprep.mubr.bf16.mxu0 %v1969_v2  ;;  %2915 = vmatprep.mubr.bf16.mxu1 %v1969_v2 }
 0x24f   :  { %2834 = vmatmul.mubr.bf16.vlgmr.msra.gmra.mrb[4].mxu0 %v1968_v4  ;;  %2916 = vmatmul.mubr.bf16.vlgmr.msra.gmra.mrb[8].mxu1 %v1968_v4 }
 0x250   :  { %3333 = vmatpush1.bf16.msra.mxu0 %v4720_v3  ;;  %4079 = vmatpush3.bf16.msra.mxu1 %v4817_v41  ;;  %v4809_v41 = vld [vmem:[#allocation7 + $0x1d4] ss:$8 sps:$4 sm:$0xff]  }
 0x251   :  { %3334 = vmatprep.subr.bf16.mxu0 %v4725_v5  ;;  %4080 = vmatprep.subr.bf16.mxu1 %v4818_v42  ;;  %v4807_v42 = vld [vmem:[#allocation7 + $0x1d0] ss:$8 sps:$4 sm:$0xff]  }
 0x254   :  { %3335 = vmatpush1.bf16.msra.mxu0 %v4723_v33  ;;  %4081 = vmatpush3.bf16.msra.mxu1 %v4819_v43 }
 0x255   :  { %3336 = vmatprep.subr.bf16.mxu0 %v4728_v7  ;;  %4082 = vmatprep.subr.bf16.mxu1 %v4820_v44  ;;  %v4812_v44 = vld [vmem:[#allocation7 + $0x1e4] ss:$8 sps:$4 sm:$0xff]  }
 0x258   :  { %3337 = vmatpush1.bf16.msra.mxu0 %v4726_v6  ;;  %4083 = vmatpush3.bf16.msra.mxu1 %v4821_v46  ;;  %v4810_v46 = vld [vmem:[#allocation7 + $0x1e0] ss:$8 sps:$4 sm:$0xff]  }
 0x259   :  { %3338 = vmatprep.subr.bf16.mxu0 %v4731_v8  ;;  %4084 = vmatprep.subr.bf16.mxu1 %v4822_v47 }
 0x25c   :  { %3339 = vmatpush1.bf16.msra.mxu0 %v4729_v9  ;;  %4085 = vmatpush3.bf16.msra.mxu1 %v4823_v48  ;;  %v4815_v48 = vld [vmem:[#allocation7 + $0x1f4] ss:$8 sps:$4 sm:$0xff]  }
 0x25d   :  { %3340 = vmatprep.subr.bf16.mxu0 %v4734_v10  ;;  %4086 = vmatprep.subr.bf16.mxu1 %v4824_v49  ;;  %v4773_v10 = vld [vmem:[#allocation7 + $0x114] ss:$8 sps:$4 sm:$0xff]   ;;  %v4813_v49 = vld [vmem:[#allocation7 + $0x1f0] ss:$8 sps:$4 sm:$0xff]  }
 0x260   :  { %3341 = vmatpush1.bf16.msra.mxu0 %v4732_v11  ;;  %4087 = vmatpush3.bf16.msra.mxu1 %v4825_v50 }
 0x261   :  { %3342 = vmatprep.subr.bf16.mxu0 %v4737_v13  ;;  %4088 = vmatprep.subr.bf16.mxu1 %v4826_v51  ;;  %v4771_v13 = vld [vmem:[#allocation7 + $0x110] ss:$8 sps:$4 sm:$0xff]   ;;  %v4828_v51 = vld [vmem:[%s5209_s7 + $0x70] sm:$0xff]  }
 0x264   :  { %3343 = vmatpush1.bf16.msra.mxu0 %v4735_v14  ;;  %v4776_v14 = vld [vmem:[#allocation7 + $0x124] ss:$8 sps:$4 sm:$0xff]   ;;  %4089 = vmatpush3.bf16.msra.mxu1 %v4827_v54 }
 0x265   :  { %3344 = vmatprep.subr.bf16.mxu0 %v4740_v15  ;;  %v4774_v15 = vld [vmem:[#allocation7 + $0x120] ss:$8 sps:$4 sm:$0xff]   ;;  %4090 = vmatprep.subr.bf16.mxu1 %v4828_v51 }
 0x268   :  { %3345 = vmatpush1.bf16.msra.mxu0 %v4738_v16  ;;  %v4779_v16 = vld [vmem:[#allocation7 + $0x134] ss:$8 sps:$4 sm:$0xff]   ;;  %4091 = vmatpush3.bf16.msra.mxu1 %v4829_v52 }
 0x269   :  { %3346 = vmatprep.subr.bf16.mxu0 %v4743_v17  ;;  %v4777_v17 = vld [vmem:[#allocation7 + $0x130] ss:$8 sps:$4 sm:$0xff]  }
 0x26c   :  { %3347 = vmatpush1.bf16.msra.mxu0 %v4741_v18  ;;  %v4782_v18 = vld [vmem:[#allocation7 + $0x144] ss:$8 sps:$4 sm:$0xff]  }
 0x26d   :  { %3348 = vmatprep.subr.bf16.mxu0 %v4746_v20  ;;  %v4780_v20 = vld [vmem:[#allocation7 + $0x140] ss:$8 sps:$4 sm:$0xff]  }
 0x270   :  { %3349 = vmatpush1.bf16.msra.mxu0 %v4744_v21  ;;  %v4785_v21 = vld [vmem:[#allocation7 + $0x154] ss:$8 sps:$4 sm:$0xff]  }
 0x271   :  { %3350 = vmatprep.subr.bf16.mxu0 %v4749_v22  ;;  %v4783_v22 = vld [vmem:[#allocation7 + $0x150] ss:$8 sps:$4 sm:$0xff]  }
 0x274   :  { %3351 = vmatpush1.bf16.msra.mxu0 %v4747_v23  ;;  %v4788_v23 = vld [vmem:[#allocation7 + $0x164] ss:$8 sps:$4 sm:$0xff]  }
 0x275   :  { %3352 = vmatprep.subr.bf16.mxu0 %v4752_v12  ;;  %v4786_v12 = vld [vmem:[#allocation7 + $0x160] ss:$8 sps:$4 sm:$0xff]  }
 0x278   :  { %3353 = vmatpush1.bf16.msra.mxu0 %v4750_v26  ;;  %v4791_v26 = vld [vmem:[#allocation7 + $0x174] ss:$8 sps:$4 sm:$0xff]  }
 0x279   :  { %3354 = vmatprep.subr.bf16.mxu0 %v4755_v27  ;;  %v4789_v27 = vld [vmem:[#allocation7 + $0x170] ss:$8 sps:$4 sm:$0xff]  }
 0x27c   :  { %3355 = vmatpush1.bf16.msra.mxu0 %v4753_v28  ;;  %v4794_v28 = vld [vmem:[#allocation7 + $0x184] ss:$8 sps:$4 sm:$0xff]  }
 0x27d   :  { %3356 = vmatprep.subr.bf16.mxu0 %v4758_v29  ;;  %v4792_v29 = vld [vmem:[#allocation7 + $0x180] ss:$8 sps:$4 sm:$0xff]  }
 0x280   :  { %3357 = vmatpush1.bf16.msra.mxu0 %v4756_v25  ;;  %v4797_v25 = vld [vmem:[#allocation7 + $0x194] ss:$8 sps:$4 sm:$0xff]  }
 0x281   :  { %3358 = vmatprep.subr.bf16.mxu0 %v4761_v30  ;;  %v4795_v30 = vld [vmem:[#allocation7 + $0x190] ss:$8 sps:$4 sm:$0xff]  }
 0x284   :  { %3359 = vmatpush1.bf16.msra.mxu0 %v4759_v35  ;;  %v4800_v35 = vld [vmem:[#allocation7 + $0x1a4] ss:$8 sps:$4 sm:$0xff]  }
 0x285   :  { %3360 = vmatprep.subr.bf16.mxu0 %v4764_v24  ;;  %v4798_v24 = vld [vmem:[#allocation7 + $0x1a0] ss:$8 sps:$4 sm:$0xff]  }
 0x288   :  { %3361 = vmatpush1.bf16.msra.mxu0 %v4762_v36  ;;  %v4803_v36 = vld [vmem:[#allocation7 + $0x1b4] ss:$8 sps:$4 sm:$0xff]  }
 0x289   :  { %3362 = vmatprep.subr.bf16.mxu0 %v4767_v37  ;;  %v4801_v37 = vld [vmem:[#allocation7 + $0x1b0] ss:$8 sps:$4 sm:$0xff]  }
 0x28c   :  { %3363 = vmatpush1.bf16.msra.mxu0 %v4765_v38  ;;  %v4806_v38 = vld [vmem:[#allocation7 + $0x1c4] ss:$8 sps:$4 sm:$0xff]  }
 0x28d   :  { %3373 = vmatprep.subr.bf16.mxu0 %v4770_v39  ;;  %v4804_v39 = vld [vmem:[#allocation7 + $0x1c0] ss:$8 sps:$4 sm:$0xff]  }
 0x322   :  { %v2835_v56 = vpop.f32.mrb[4].mxu0  ;;  %v5161_v57 = vpop.f32.mrb[8].mxu1 }
 0x323   :  { %v4106_v58 = vadd.f32 %v2835_v56, %v2103_v53  ;;  %v2837_v59 = vpop.f32.mrb[5].mxu0  ;;  %v2919_v60 = vpop.f32.mrb[9].mxu1  ;;  %v4108_v43 = vadd.f32 %v5161_v57, %v2111_v40  ;;  %v4830_v53 = vld [vmem:[%s5209_s7 + $0x78] sm:$0xff]  }
 0x324   :  { %v4107_v61 = vadd.f32 %v2837_v59, %v2107_v55  ;;  %v4109_v62 = vadd.f32 %v2919_v60, %v2115_v45  ;;  %v2839_v63 = vpop.f32.mrb[6].mxu0  ;;  %v2921_v0 = vpop.f32.mrb[10].mxu1  ;;  %v4831_v55 = vld [vmem:[%s5209_s7 + $0x38] sm:$0xff]   ;;  %4092 = vmatprep.subr.bf16.mxu1 %v4830_v53  ;;  %v3000_v45 = vld [vmem:[%s5208_s6] sm:$0x3] }
 0x325   :  { %v2924_v1 = vmul.f32 0.01, %v4106_v58  ;;  %v2840_v2 = vpop.f32.mrb[7].mxu0  ;;  %v2922_v3 = vpop.f32.mrb[11].mxu1  ;;  %v2926_v47 = vmul.f32 0.01, %v4108_v43  ;;  %4093 = vmatpush3.bf16.msra.mxu1 %v4831_v55  ;;  %v3005_v56 = vrot.slane %v3000_v45, %v5092_v19  ;;  %v3009_v57 = vrot.slane %v3000_v45, %v5100_v34 }
 0x326   :  { %v2925_v4 = vmul.f32 0.01, %v4107_v61  ;;  %v2927_v5 = vmul.f32 0.01, %v4109_v62  ;;  %v4061_v19 = vld [vmem:[%s5210_s8] ss:$0 sm:$0xff] }
 0x327   :  { %v2928_v33 = vmax.f32 %v4106_v58, %v2924_v1  ;;  %v2930_v50 = vmax.f32 %v4108_v43, %v2926_v47 }
 0x328   :  { %v2929_v7 = vmax.f32 %v4107_v61, %v2925_v4  ;;  %v2931_v6 = vmax.f32 %v4109_v62, %v2927_v5 }
 0x329   :  { %v2932_v9 = vpack.c.bf16 %v2928_v33, %v2928_v33  ;;  %v2934_v32 = vpack.c.bf16 %v2930_v50, %v2930_v50 }
 0x32a   :  { %v2933_v8 = vpack.c.bf16 %v2929_v7, %v2929_v7  ;;  %v2935_v11 = vpack.c.bf16 %v2931_v6, %v2931_v6 }
 0x32c   :  { %3364 = vmatprep.mubr.bf16.mxu0 %v2933_v8 }
 0x32d   :  { %3365 = vmatmul.mubr.bf16.vlgmr.msra.gmra.mrb[8].mxu0 %v2932_v9 }
 0x32e   :  { %3374 = vmatpush1.bf16.msra.mxu0 %v4768_v31  ;;  %3405 = vmatprep.mubr.bf16.mxu0 %v2935_v11 }
 0x32f   :  { %3375 = vmatprep.subr.bf16.mxu0 %v4773_v10 }
 0x332   :  { %3376 = vmatpush1.bf16.msra.mxu0 %v4771_v13 }
 0x333   :  { %3377 = vmatprep.subr.bf16.mxu0 %v4776_v14 }
 0x336   :  { %3378 = vmatpush1.bf16.msra.mxu0 %v4774_v15 }
 0x337   :  { %3379 = vmatprep.subr.bf16.mxu0 %v4779_v16 }
 0x33a   :  { %3380 = vmatpush1.bf16.msra.mxu0 %v4777_v17 }
 0x33b   :  { %3381 = vmatprep.subr.bf16.mxu0 %v4782_v18 }
 0x33e   :  { %3382 = vmatpush1.bf16.msra.mxu0 %v4780_v20 }
 0x33f   :  { %3383 = vmatprep.subr.bf16.mxu0 %v4785_v21 }
 0x342   :  { %3384 = vmatpush1.bf16.msra.mxu0 %v4783_v22 }
 0x343   :  { %3385 = vmatprep.subr.bf16.mxu0 %v4788_v23 }
 0x346   :  { %3386 = vmatpush1.bf16.msra.mxu0 %v4786_v12 }
 0x347   :  { %3387 = vmatprep.subr.bf16.mxu0 %v4791_v26 }
 0x34a   :  { %3388 = vmatpush1.bf16.msra.mxu0 %v4789_v27 }
 0x34b   :  { %3389 = vmatprep.subr.bf16.mxu0 %v4794_v28 }
 0x34e   :  { %3390 = vmatpush1.bf16.msra.mxu0 %v4792_v29 }
 0x34f   :  { %3391 = vmatprep.subr.bf16.mxu0 %v4797_v25 }
 0x352   :  { %3392 = vmatpush1.bf16.msra.mxu0 %v4795_v30 }
 0x353   :  { %3393 = vmatprep.subr.bf16.mxu0 %v4800_v35 }
 0x356   :  { %3394 = vmatpush1.bf16.msra.mxu0 %v4798_v24 }
 0x357   :  { %3395 = vmatprep.subr.bf16.mxu0 %v4803_v36 }
 0x35a   :  { %3396 = vmatpush1.bf16.msra.mxu0 %v4801_v37 }
 0x35b   :  { %3397 = vmatprep.subr.bf16.mxu0 %v4806_v38 }
 0x35e   :  { %3398 = vmatpush1.bf16.msra.mxu0 %v4804_v39 }
 0x35f   :  { %3399 = vmatprep.subr.bf16.mxu0 %v4809_v41 }
 0x362   :  { %3400 = vmatpush1.bf16.msra.mxu0 %v4807_v42 }
 0x363   :  { %3401 = vmatprep.subr.bf16.mxu0 %v4812_v44 }
 0x366   :  { %3402 = vmatpush1.bf16.msra.mxu0 %v4810_v46 }
 0x367   :  { %3403 = vmatprep.subr.bf16.mxu0 %v4815_v48 }
 0x36a   :  { %3404 = vmatpush1.bf16.msra.mxu0 %v4813_v49 }
 0x36d   :  { %3406 = vmatmul.mubr.bf16.vlgmr.msra.gmra.mrb[8].mxu0 %v2934_v32 }
 0x440   :  { %v3407_v58 = vpop.f32.mrb[8].mxu0 }
 0x441   :  { %v4110_v59 = vadd.f32 %v3407_v58, %v3005_v56  ;;  %v3409_v60 = vpop.f32.mrb[9].mxu0 }
 0x442   :  { %v4111_v61 = vadd.f32 %v3409_v60, %v3009_v57  ;;  %v3411_v62 = vpop.f32.mrb[10].mxu0 }
 0x443   :  { %v3414_v63 = vmul.f32 0.01, %v4110_v59  ;;  %v3412_v0 = vpop.f32.mrb[11].mxu0 }
 0x444   :  { %v3415_v1 = vmul.f32 0.01, %v4111_v61 }
 0x445   :  { %v3416_v2 = vmax.f32 %v4110_v59, %v3414_v63 }
 0x446   :  { %v3417_v3 = vmax.f32 %v4111_v61, %v3415_v1 }
 0x447   :  { %v3418_v5 = vpack.c.bf16 %v3416_v2, %v3416_v2 }
 0x448   :  { %v3419_v4 = vpack.c.bf16 %v3417_v3, %v3417_v3 }
 0x44a   :  { %3587 = vmatprep.mubr.bf16.mxu1 %v3419_v4 }
 0x44b   :  { %3588 = vmatmul.mubr.bf16.vlgmr.msra.gmra.mrb[12].mxu1 %v3418_v5 }
 0x51e   :  { %v4094_v33 = vpop.f32.mrb[12].mxu1 }
 0x51f   :  { %v4095_v34 = vpop.f32.mrb[13].mxu1 }
 0x520   :  { %v4096_v7 = vadd.f32 %v4095_v34, %v4094_v33  ;;  %v4097_v6 = vpop.f32.mrb[14].mxu1 }
 0x521   :  { %v4098_v8 = vpop.f32.mrb[15].mxu1 }
 0x522   :  { %v3590_v31 = vadd.f32 %v4096_v7, %v4061_v19 }
 0x524   :  { %3596 = vst.msk [vmem:[#allocation8] sm:$0xff] %vm3595_vm2, %v3590_v31 }
 0x525   :  { %4909 = shalt.err (!%p4906_p0)
}
 0x526   :  { %s4910_s8 = scalar_lea.hbm %s5211_s9, 128 }
 0x527   :  { %p4911_p1 = scmp.ne.s32.totalorder %s5211_s9, %s4910_s8  ;;  %p4914_p2 = scmp.lt.u32.totalorder %s4910_s8, %s5211_s9 }
 0x529   :  { %p4916_p3 = pnand %p4914_p2, %p4911_p1 }
 0x52b   :  { %4919 = shalt.err (!%p4916_p3)
}
 0x52c   :  { %3606 = dma.vmem_to_hbm [thread:$0]  %s3604_s27, 128, %s5211_s9, [#allocation4]  }
 0x52d   :  { %4924 = dma.done.wait [#allocation4], 128  }
 0x52e   :  { %4925 = vsyncadd [#allocation4], 4294967168 }
 0x52f   :  { %3610 = vsyncpa [#allocation3], 1 }
 0x530   :  { %3611 = vsyncpa [#allocation6], 1 }
 0x531   :  { %3612 = vsyncpa [#allocation4], 1 }

</bundles_post_ra>
